<compile_context>
chip_gen: v7x
topology: tpu7x:2x2x1
jax: 0.10.0
libtpu: 0.0.40
codegen_flags: <defaults>
</compile_context>

<pallas_src>
import functools

import numpy as np
import jax
import jax.numpy as jnp
from jax.experimental import pallas as pl
from jax.experimental.pallas import tpu as pltpu


# ---------------------------------------------------------------------------
# Kernel 1: gate MLP (batch independent — computed once per forward)
# ---------------------------------------------------------------------------
def _gate_kernel(pe_ref, w1_ref, b1_ref, beta_ref, rm_ref, rv_ref, w_ref, b_ref, o_ref):
    """Gate MLP evaluated in transposed orientation.

    Rows = gate_window channels (K), columns = energy positions (E), so the long E
    axis lands on the 128-wide lane dimension and the output is already the
    `gate(pe).T` layout the batch kernel consumes (one lane-dense row per window tap).
    """
    # Linear(1, K):  t[c, e] = W1[c] * pe[e] + b1[c]
    t = w1_ref[...] * pe_ref[...] + b1_ref[...]            # (K,1)*(1,E)+(K,1) -> (K,E)
    n_blocks, K = w_ref.shape[0], w_ref.shape[1]
    for i in range(n_blocks):                              # static unroll (4 blocks)
        # Parametric Swish, per-channel beta (channel axis = K rows here).
        beta = beta_ref[i]                                 # (K, 1)
        t = t * jax.nn.sigmoid((1.0 + beta) * t)
        # BatchNorm1d(affine=False), eval mode -> running statistics.
        t = (t - rm_ref[i]) / jnp.sqrt(rv_ref[i] + 1e-5)
        # Dropout is identity at inference.
        # Linear(K, K):  x @ W.T  ==  W @ x  in transposed orientation.  K == 13 is
        # far below an MXU tile, so do it as K broadcast-FMAs on the VPU (exact f32).
        W = w_ref[i]                                       # (K, K)
        acc = W[:, 0:1] * t[0:1, :]
        for j in range(1, K):
            acc = acc + W[:, j:j + 1] * t[j:j + 1, :]
        t = acc + b_ref[i]                                 # (K, E)
    # Softmax over the gate_window axis (rows).
    t = t - jnp.max(t, axis=0, keepdims=True)
    e = jnp.exp(t)
    o_ref[...] = (e / jnp.sum(e, axis=0, keepdims=True)).astype(o_ref.dtype)


# ---------------------------------------------------------------------------
# Kernel 2: fused per-spectrum path
#   interp+Conv1d (folded -> one MXU matmul)  ->  Softplus(beta=2)  ->  gated window sum
# ---------------------------------------------------------------------------
def _intensity_gate_kernel(m_ref, cbias_ref, sel_ref, x_ref, o_ref):
    E = o_ref.shape[1]            # dim_out
    K = sel_ref.shape[0]          # gate_window
    x = x_ref[...].astype(jnp.float32)                     # (tb, dim_in)

    # align_corners interpolation and Conv1d(1,1,k,'valid') are both linear in the
    # input, so they were folded into a single matrix in the wrapper: one contraction.
    conv = jnp.dot(x, m_ref[...], preferred_element_type=jnp.float32) + cbias_ref[0]

    # Softplus(beta=2) with PyTorch's threshold=20 linearisation.
    z = 2.0 * conv
    sp = jnp.where(z > 20.0, conv,
                   0.5 * jnp.log(1.0 + jnp.exp(jnp.minimum(z, 20.0))))

    # "Upend" identity-stencil conv + gating:  out[b, e] = sum_k sp[b, e+k] * sel[k, e]
    sel = sel_ref[...]                                     # (K, E)
    acc = sp[:, 0:E] * sel[0:1, :]
    for k in range(1, K):                                  # static unroll, K == 13
        acc = acc + sp[:, k:k + E] * sel[k:k + 1, :]
    o_ref[...] = acc.astype(o_ref.dtype)


# ---------------------------------------------------------------------------
# Host-side helpers / wrapper
# ---------------------------------------------------------------------------
def _interp_matrix(n_in: int, n_out: int) -> np.ndarray:
    """align_corners=True linear-interp matrix A with  y = x @ A,   A: (n_in, n_out)."""
    A = np.zeros((n_in, n_out), dtype=np.float32)
    if n_out == 1:
        A[0, 0] = 1.0
        return A
    scale = (n_in - 1) / (n_out - 1)
    for p in range(n_out):
        src = p * scale
        i0 = min(int(np.floor(src)), n_in - 1)
        frac = src - i0
        i1 = min(i0 + 1, n_in - 1)
        A[i0, p] += 1.0 - frac
        A[i1, p] += frac
    return A


def exlayers_forward(spec, params, *, dim_out, gate_window=13, hidden_kernel_size=3,
                     n_exlayers=1, batch_tile=512):
    """Eval-mode ExLayers forward.  spec: (B, dim_in)  ->  (B, dim_out)."""
    assert n_exlayers == 1  # TODO(synk): multi-channel Conv1d stack not ported.
    B, dim_in = spec.shape
    K = gate_window
    pre = dim_out + (gate_window - 1) + (hidden_kernel_size - 1) * n_exlayers
    Lc = pre - (hidden_kernel_size - 1)          # conv 'valid' length = dim_out + K - 1
    f32 = jnp.float32

    # Static (shape-only) interpolation matrix, folded with the Conv1d(1,1,k) weights.
    A = jnp.asarray(_interp_matrix(dim_in, pre))             # (dim_in, pre)
    w = params["conv_w"].astype(f32)
    M = w[0] * A[:, 0:Lc]
    for j in range(1, hidden_kernel_size):
        M = M + w[j] * A[:, j:j + Lc]                        # (dim_in, Lc)
    conv_b = params["conv_b"].reshape((1,)).astype(f32)

    # --- gate weights: batch independent, computed once, lane-dense (K, dim_out) ----
    pe_row = (jnp.arange(dim_out, dtype=f32) + 1.0).reshape(1, dim_out)
    vmem = pl.BlockSpec(memory_space=pltpu.MemorySpace.VMEM)
    sel = pl.pallas_call(
        _gate_kernel,
        out_shape=jax.ShapeDtypeStruct((K, dim_out), f32),
        in_specs=[vmem] * 8,
        out_specs=vmem,
    )(
        pe_row,
        params["gate_w1"].reshape(K, 1).astype(f32),
        params["gate_b1"].reshape(K, 1).astype(f32),
        params["gate_beta"].reshape(-1, K, 1).astype(f32),
        params["gate_rm"].reshape(-1, K, 1).astype(f32),
        params["gate_rv"].reshape(-1, K, 1).astype(f32),
        params["gate_w"].astype(f32),                        # (n_blocks, K, K)
        params["gate_b"].reshape(-1, K, 1).astype(f32),
    )

    # --- fused batched spectrum path: grid over batch only, "parallel" semantics -----
    tb = B if B <= batch_tile else max(8, (batch_tile // 8) * 8)
    grid = (pl.cdiv(B, tb),)
    out = pl.pallas_call(
        _intensity_gate_kernel,
        out_shape=jax.ShapeDtypeStruct((B, dim_out), spec.dtype),
        grid=grid,
        in_specs=[
            pl.BlockSpec((dim_in, Lc), lambda i: (0, 0)),          # folded interp+conv matrix
            pl.BlockSpec(memory_space=pltpu.MemorySpace.SMEM),     # conv bias scalar
            pl.BlockSpec((K, dim_out), lambda i: (0, 0)),          # gate weights (K, E)
            pl.BlockSpec((tb, dim_in), lambda i: (i, 0)),          # spectra batch tile
        ],
        out_specs=pl.BlockSpec((tb, dim_out), lambda i: (i, 0)),
        compiler_params=pltpu.CompilerParams(dimension_semantics=("parallel",)),
    )(M, conv_b, sel, spec)
    return out


# ---------------------------------------------------------------------------
# Pure-jnp reference (element-wise math only, exact f32) for validation
# ---------------------------------------------------------------------------
def exlayers_ref(spec, params, *, dim_out, gate_window=13, hidden_kernel_size=3):
    B, dim_in = spec.shape
    f32 = jnp.float32
    spec = spec.astype(f32)
    pre = dim_out + (gate_window - 1) + (hidden_kernel_size - 1)
    # F.interpolate(mode='linear', align_corners=True), gather formulation.
    src = jnp.arange(pre, dtype=f32) * ((dim_in - 1) / (pre - 1))
    i0 = jnp.clip(jnp.floor(src).astype(jnp.int32), 0, dim_in - 1)
    frac = src - i0.astype(f32)
    i1 = jnp.clip(i0 + 1, 0, dim_in - 1)
    y = spec[:, i0] * (1.0 - frac) + spec[:, i1] * frac            # (B, pre)
    # Conv1d(1, 1, k, 'valid') + Softplus(beta=2, threshold=20).
    w = params["conv_w"].astype(f32)
    Lc = pre - (hidden_kernel_size - 1)
    conv = params["conv_b"].astype(f32) + sum(
        w[j] * y[:, j:j + Lc] for j in range(hidden_kernel_size))
    z = 2.0 * conv
    sp = jnp.where(z > 20.0, conv, 0.5 * jnp.log(1.0 + jnp.exp(jnp.minimum(z, 20.0))))
    # Gate MLP on the position embedding (natural orientation).
    K = gate_window
    pe = (jnp.arange(dim_out, dtype=f32) + 1.0)[:, None]           # (E, 1)
    h = pe * params["gate_w1"].reshape(1, K) + params["gate_b1"].reshape(1, K)
    for i in range(params["gate_w"].shape[0]):
        h = h * jax.nn.sigmoid((1.0 + params["gate_beta"][i])[None, :] * h)
        h = (h - params["gate_rm"][i][None, :]) / jnp.sqrt(params["gate_rv"][i][None, :] + 1e-5)
        h = jnp.einsum("ej,cj->ec", h, params["gate_w"][i],
                       precision=jax.lax.Precision.HIGHEST) + params["gate_b"][i][None, :]
    h = jax.nn.softmax(h, axis=1)                                  # (E, K)
    # Upend conv (identity stencil) + windowed gating sum.
    out = jnp.zeros((B, dim_out), f32)
    for k in range(K):
        out = out + sp[:, k:k + dim_out] * h[:, k][None, :]
    return out.astype(spec.dtype)


if __name__ == "__main__":
    key = jax.random.PRNGKey(0)
    keys = jax.random.split(key, 10)

    # Shapes implied by the module: spec (batch, dim_in); defaults gate_window=13,
    # hidden_kernel_size=3, n_exlayers=1, n_gate_layers=5.
    B, dim_in, dim_out = 2, 32, 16
    K, ks = 13, 3
    n_blocks = 5 - 1          # n_gate_layers=5 -> 4 (Swish, BN, Dropout, Linear) blocks

    spec = jax.random.normal(keys[0], (B, dim_in), dtype=jnp.float32)

    params = {
        # intensity_adjuster: Conv1d(1, 1, 3, 'valid') + Softplus(beta=2)
        "conv_w": 0.3 * jax.random.normal(keys[1], (ks,), dtype=jnp.float32),
        "conv_b": 0.05 * jax.random.normal(keys[2], (), dtype=jnp.float32),
        # gate_weights MLP
        "gate_w1": 0.2 * jax.random.normal(keys[3], (K, 1), dtype=jnp.float32),
        "gate_b1": 0.1 * jax.random.normal(keys[4], (K,), dtype=jnp.float32),
        # Swish(num_parameters=13, init=1.0) -> beta initialised at 1.0*4 - 1 = 3;
        # perturbed per channel so the per-channel broadcast path is exercised.
        "gate_beta": 3.0 + 0.25 * jax.random.normal(keys[5], (n_blocks, K), dtype=jnp.float32),
        # BatchNorm1d running statistics (affine=False, eval mode).
        "gate_rm": 0.1 * jax.random.normal(keys[6], (n_blocks, K), dtype=jnp.float32),
        "gate_rv": 1.0 + 0.2 * jax.random.uniform(keys[7], (n_blocks, K), dtype=jnp.float32),
        "gate_w": (13.0 ** -0.5) * jax.random.normal(keys[8], (n_blocks, K, K), dtype=jnp.float32),
        "gate_b": 0.1 * jax.random.normal(keys[9], (n_blocks, K), dtype=jnp.float32),
    }

    fwd = jax.jit(functools.partial(exlayers_forward, dim_out=dim_out,
                                    gate_window=K, hidden_kernel_size=ks))
    out = jax.block_until_ready(fwd(spec, params))
    ref = exlayers_ref(spec, params, dim_out=dim_out, gate_window=K, hidden_kernel_size=ks)

    assert out.shape == (B, dim_out)
    # f32 matmuls on the MXU are emulated via bf16 passes; allow a small tolerance.
    assert jnp.allclose(out, ref, atol=2e-3, rtol=2e-3), "mismatch vs pure-JAX reference"

    print("KERNEL_OK")
</pallas_src>

<mosaic_0001>
module attributes {stable_mosaic.version = 11 : i64} {
  func.func @_intensity_gate_kernel(%arg0: i32, %arg1: memref<32x28xf32, #tpu.memory_space<vmem>>, %arg2: memref<1xf32, #tpu.memory_space<smem>>, %arg3: memref<13x16xf32, #tpu.memory_space<vmem>>, %arg4: memref<2x32xf32, #tpu.memory_space<vmem>>, %arg5: memref<2x16xf32, #tpu.memory_space<vmem>>) attributes {dimension_semantics = [#tpu.dimension_semantics<parallel>], iteration_bounds = array<i64: 1>, scalar_prefetch = 0 : i64, scratch_operands = 0 : i64, tpu.core_type = #tpu.core_type<tc>, window_params = [{pipeline_mode = #tpu.pipeline_mode<synchronous>, transform_indices = @transform_0, window_bounds = array<i64: 32, 28>}, {transform_indices = @transform_1, window_bounds = array<i64: 1>}, {pipeline_mode = #tpu.pipeline_mode<synchronous>, transform_indices = @transform_2, window_bounds = array<i64: 13, 16>}, {transform_indices = @transform_3, window_bounds = array<i64: 2, 32>}, {transform_indices = @transform_4, window_bounds = array<i64: 2, 16>}]} {
    %c0 = arith.constant 0 : index
    %c0_0 = arith.constant 0 : index
    %0 = vector.load %arg4[%c0, %c0_0] : memref<2x32xf32, #tpu.memory_space<vmem>>, vector<2x32xf32>
    %c0_1 = arith.constant 0 : index
    %c0_2 = arith.constant 0 : index
    %1 = vector.load %arg1[%c0_1, %c0_2] : memref<32x28xf32, #tpu.memory_space<vmem>>, vector<32x28xf32>
    %cst = arith.constant dense<0.000000e+00> : vector<2x28xf32>
    %2 = tpu.matmul %0, %1, %cst {dimension_numbers = #tpu.dot_dimension_numbers<[1], [0], [0], [1], [0, 0, 1, 1], [], []>} : vector<2x32xf32>, vector<32x28xf32>, vector<2x28xf32> -> vector<2x28xf32>
    %c0_3 = arith.constant 0 : index
    %3 = memref.load %arg2[%c0_3] : memref<1xf32, #tpu.memory_space<smem>>
    %4 = vector.broadcast %3 : f32 to vector<2x28xf32>
    %5 = arith.addf %2, %4 : vector<2x28xf32>
    %cst_4 = arith.constant 2.000000e+00 : f32
    %6 = vector.broadcast %cst_4 : f32 to vector<2x28xf32>
    %7 = arith.mulf %6, %5 : vector<2x28xf32>
    %cst_5 = arith.constant 2.000000e+01 : f32
    %8 = vector.broadcast %cst_5 : f32 to vector<2x28xf32>
    %9 = arith.cmpf ogt, %7, %8 : vector<2x28xf32>
    %cst_6 = arith.constant 2.000000e+01 : f32
    %10 = vector.broadcast %cst_6 : f32 to vector<2x28xf32>
    %11 = arith.minimumf %7, %10 : vector<2x28xf32>
    %12 = math.exp %11 : vector<2x28xf32>
    %cst_7 = arith.constant 1.000000e+00 : f32
    %13 = vector.broadcast %cst_7 : f32 to vector<2x28xf32>
    %14 = arith.addf %13, %12 : vector<2x28xf32>
    %15 = math.log %14 : vector<2x28xf32>
    %cst_8 = arith.constant 5.000000e-01 : f32
    %16 = vector.broadcast %cst_8 : f32 to vector<2x28xf32>
    %17 = arith.mulf %16, %15 : vector<2x28xf32>
    %18 = arith.select %9, %5, %17 : vector<2x28xi1>, vector<2x28xf32>
    %c0_9 = arith.constant 0 : index
    %c0_10 = arith.constant 0 : index
    %19 = vector.load %arg3[%c0_9, %c0_10] : memref<13x16xf32, #tpu.memory_space<vmem>>, vector<13x16xf32>
    %20 = vector.extract_strided_slice %18 {offsets = [0, 0], sizes = [2, 16], strides = [1, 1]} : vector<2x28xf32> to vector<2x16xf32>
    %21 = vector.extract_strided_slice %19 {offsets = [0, 0], sizes = [1, 16], strides = [1, 1]} : vector<13x16xf32> to vector<1x16xf32>
    %22 = vector.broadcast %21 : vector<1x16xf32> to vector<2x16xf32>
    %23 = arith.mulf %20, %22 : vector<2x16xf32>
    %24 = vector.extract_strided_slice %18 {offsets = [0, 1], sizes = [2, 16], strides = [1, 1]} : vector<2x28xf32> to vector<2x16xf32>
    %25 = vector.extract_strided_slice %19 {offsets = [1, 0], sizes = [1, 16], strides = [1, 1]} : vector<13x16xf32> to vector<1x16xf32>
    %26 = vector.broadcast %25 : vector<1x16xf32> to vector<2x16xf32>
    %27 = arith.mulf %24, %26 : vector<2x16xf32>
    %28 = arith.addf %23, %27 : vector<2x16xf32>
    %29 = vector.extract_strided_slice %18 {offsets = [0, 2], sizes = [2, 16], strides = [1, 1]} : vector<2x28xf32> to vector<2x16xf32>
    %30 = vector.extract_strided_slice %19 {offsets = [2, 0], sizes = [1, 16], strides = [1, 1]} : vector<13x16xf32> to vector<1x16xf32>
    %31 = vector.broadcast %30 : vector<1x16xf32> to vector<2x16xf32>
    %32 = arith.mulf %29, %31 : vector<2x16xf32>
    %33 = arith.addf %28, %32 : vector<2x16xf32>
    %34 = vector.extract_strided_slice %18 {offsets = [0, 3], sizes = [2, 16], strides = [1, 1]} : vector<2x28xf32> to vector<2x16xf32>
    %35 = vector.extract_strided_slice %19 {offsets = [3, 0], sizes = [1, 16], strides = [1, 1]} : vector<13x16xf32> to vector<1x16xf32>
    %36 = vector.broadcast %35 : vector<1x16xf32> to vector<2x16xf32>
    %37 = arith.mulf %34, %36 : vector<2x16xf32>
    %38 = arith.addf %33, %37 : vector<2x16xf32>
    %39 = vector.extract_strided_slice %18 {offsets = [0, 4], sizes = [2, 16], strides = [1, 1]} : vector<2x28xf32> to vector<2x16xf32>
    %40 = vector.extract_strided_slice %19 {offsets = [4, 0], sizes = [1, 16], strides = [1, 1]} : vector<13x16xf32> to vector<1x16xf32>
    %41 = vector.broadcast %40 : vector<1x16xf32> to vector<2x16xf32>
    %42 = arith.mulf %39, %41 : vector<2x16xf32>
    %43 = arith.addf %38, %42 : vector<2x16xf32>
    %44 = vector.extract_strided_slice %18 {offsets = [0, 5], sizes = [2, 16], strides = [1, 1]} : vector<2x28xf32> to vector<2x16xf32>
    %45 = vector.extract_strided_slice %19 {offsets = [5, 0], sizes = [1, 16], strides = [1, 1]} : vector<13x16xf32> to vector<1x16xf32>
    %46 = vector.broadcast %45 : vector<1x16xf32> to vector<2x16xf32>
    %47 = arith.mulf %44, %46 : vector<2x16xf32>
    %48 = arith.addf %43, %47 : vector<2x16xf32>
    %49 = vector.extract_strided_slice %18 {offsets = [0, 6], sizes = [2, 16], strides = [1, 1]} : vector<2x28xf32> to vector<2x16xf32>
    %50 = vector.extract_strided_slice %19 {offsets = [6, 0], sizes = [1, 16], strides = [1, 1]} : vector<13x16xf32> to vector<1x16xf32>
    %51 = vector.broadcast %50 : vector<1x16xf32> to vector<2x16xf32>
    %52 = arith.mulf %49, %51 : vector<2x16xf32>
    %53 = arith.addf %48, %52 : vector<2x16xf32>
    %54 = vector.extract_strided_slice %18 {offsets = [0, 7], sizes = [2, 16], strides = [1, 1]} : vector<2x28xf32> to vector<2x16xf32>
    %55 = vector.extract_strided_slice %19 {offsets = [7, 0], sizes = [1, 16], strides = [1, 1]} : vector<13x16xf32> to vector<1x16xf32>
    %56 = vector.broadcast %55 : vector<1x16xf32> to vector<2x16xf32>
    %57 = arith.mulf %54, %56 : vector<2x16xf32>
    %58 = arith.addf %53, %57 : vector<2x16xf32>
    %59 = vector.extract_strided_slice %18 {offsets = [0, 8], sizes = [2, 16], strides = [1, 1]} : vector<2x28xf32> to vector<2x16xf32>
    %60 = vector.extract_strided_slice %19 {offsets = [8, 0], sizes = [1, 16], strides = [1, 1]} : vector<13x16xf32> to vector<1x16xf32>
    %61 = vector.broadcast %60 : vector<1x16xf32> to vector<2x16xf32>
    %62 = arith.mulf %59, %61 : vector<2x16xf32>
    %63 = arith.addf %58, %62 : vector<2x16xf32>
    %64 = vector.extract_strided_slice %18 {offsets = [0, 9], sizes = [2, 16], strides = [1, 1]} : vector<2x28xf32> to vector<2x16xf32>
    %65 = vector.extract_strided_slice %19 {offsets = [9, 0], sizes = [1, 16], strides = [1, 1]} : vector<13x16xf32> to vector<1x16xf32>
    %66 = vector.broadcast %65 : vector<1x16xf32> to vector<2x16xf32>
    %67 = arith.mulf %64, %66 : vector<2x16xf32>
    %68 = arith.addf %63, %67 : vector<2x16xf32>
    %69 = vector.extract_strided_slice %18 {offsets = [0, 10], sizes = [2, 16], strides = [1, 1]} : vector<2x28xf32> to vector<2x16xf32>
    %70 = vector.extract_strided_slice %19 {offsets = [10, 0], sizes = [1, 16], strides = [1, 1]} : vector<13x16xf32> to vector<1x16xf32>
    %71 = vector.broadcast %70 : vector<1x16xf32> to vector<2x16xf32>
    %72 = arith.mulf %69, %71 : vector<2x16xf32>
    %73 = arith.addf %68, %72 : vector<2x16xf32>
    %74 = vector.extract_strided_slice %18 {offsets = [0, 11], sizes = [2, 16], strides = [1, 1]} : vector<2x28xf32> to vector<2x16xf32>
    %75 = vector.extract_strided_slice %19 {offsets = [11, 0], sizes = [1, 16], strides = [1, 1]} : vector<13x16xf32> to vector<1x16xf32>
    %76 = vector.broadcast %75 : vector<1x16xf32> to vector<2x16xf32>
    %77 = arith.mulf %74, %76 : vector<2x16xf32>
    %78 = arith.addf %73, %77 : vector<2x16xf32>
    %79 = vector.extract_strided_slice %18 {offsets = [0, 12], sizes = [2, 16], strides = [1, 1]} : vector<2x28xf32> to vector<2x16xf32>
    %80 = vector.extract_strided_slice %19 {offsets = [12, 0], sizes = [1, 16], strides = [1, 1]} : vector<13x16xf32> to vector<1x16xf32>
    %81 = vector.broadcast %80 : vector<1x16xf32> to vector<2x16xf32>
    %82 = arith.mulf %79, %81 : vector<2x16xf32>
    %83 = arith.addf %78, %82 : vector<2x16xf32>
    %c0_11 = arith.constant 0 : index
    %c0_12 = arith.constant 0 : index
    %84 = vector.load %arg5[%c0_11, %c0_12] : memref<2x16xf32, #tpu.memory_space<vmem>>, vector<2x16xf32>
    tpu.vector_store %arg5[%c0_11, %c0_12], %83 {strides = array<i32>} : memref<2x16xf32, #tpu.memory_space<vmem>>, vector<2x16xf32>,
    return
  }
  func.func @transform_0(%arg0: i32) -> (i32, i32) {
    %c0_i32 = arith.constant 0 : i32
    %c0_i32_0 = arith.constant 0 : i32
    %c0_i32_1 = arith.constant 0 : i32
    return %c0_i32, %c0_i32_0 : i32, i32
  }
  func.func @transform_1(%arg0: i32) -> i32 {
    %c0_i32 = arith.constant 0 : i32
    %c0_i32_0 = arith.constant 0 : i32
    return %c0_i32 : i32
  }
  func.func @transform_2(%arg0: i32) -> (i32, i32) {
    %c0_i32 = arith.constant 0 : i32
    %c0_i32_0 = arith.constant 0 : i32
    %c0_i32_1 = arith.constant 0 : i32
    return %c0_i32, %c0_i32_0 : i32, i32
  }
  func.func @transform_3(%arg0: i32) -> (i32, i32) {
    %c0_i32 = arith.constant 0 : i32
    %c0_i32_0 = arith.constant 0 : i32
    return %arg0, %c0_i32 : i32, i32
  }
  func.func @transform_4(%arg0: i32) -> (i32, i32) {
    %c0_i32 = arith.constant 0 : i32
    %c0_i32_0 = arith.constant 0 : i32
    return %arg0, %c0_i32 : i32, i32
  }
}

module attributes {stable_mosaic.version = 11 : i64} {
  func.func @_gate_kernel(%arg0: memref<1x16xf32, #tpu.memory_space<vmem>>, %arg1: memref<13x1xf32, #tpu.memory_space<vmem>>, %arg2: memref<13x1xf32, #tpu.memory_space<vmem>>, %arg3: memref<4x13x1xf32, #tpu.memory_space<vmem>>, %arg4: memref<4x13x1xf32, #tpu.memory_space<vmem>>, %arg5: memref<4x13x1xf32, #tpu.memory_space<vmem>>, %arg6: memref<4x13x13xf32, #tpu.memory_space<vmem>>, %arg7: memref<4x13x1xf32, #tpu.memory_space<vmem>>, %arg8: memref<13x16xf32, #tpu.memory_space<vmem>>) attributes {dimension_semantics = [], scalar_prefetch = 0 : i64, scratch_operands = 0 : i64, tpu.core_type = #tpu.core_type<tc>} {
    %c0 = arith.constant 0 : index
    %c0_0 = arith.constant 0 : index
    %0 = vector.load %arg1[%c0, %c0_0] : memref<13x1xf32, #tpu.memory_space<vmem>>, vector<13x1xf32>
    %c0_1 = arith.constant 0 : index
    %c0_2 = arith.constant 0 : index
    %1 = vector.load %arg0[%c0_1, %c0_2] : memref<1x16xf32, #tpu.memory_space<vmem>>, vector<1x16xf32>
    %2 = vector.broadcast %0 : vector<13x1xf32> to vector<13x16xf32>
    %3 = vector.broadcast %1 : vector<1x16xf32> to vector<13x16xf32>
    %4 = arith.mulf %2, %3 : vector<13x16xf32>
    %c0_3 = arith.constant 0 : index
    %c0_4 = arith.constant 0 : index
    %5 = vector.load %arg2[%c0_3, %c0_4] : memref<13x1xf32, #tpu.memory_space<vmem>>, vector<13x1xf32>
    %6 = vector.broadcast %5 : vector<13x1xf32> to vector<13x16xf32>
    %7 = arith.addf %4, %6 : vector<13x16xf32>
    %c0_5 = arith.constant 0 : index
    %c0_6 = arith.constant 0 : index
    %c0_7 = arith.constant 0 : index
    %8 = vector.load %arg3[%c0_5, %c0_6, %c0_7] : memref<4x13x1xf32, #tpu.memory_space<vmem>>, vector<1x13x1xf32>
    %9 = vector.shape_cast %8 : vector<1x13x1xf32> to vector<13x1xf32>
    %cst = arith.constant 1.000000e+00 : f32
    %10 = vector.broadcast %cst : f32 to vector<13x1xf32>
    %11 = arith.addf %10, %9 : vector<13x1xf32>
    %12 = vector.broadcast %11 : vector<13x1xf32> to vector<13x16xf32>
    %13 = arith.mulf %12, %7 : vector<13x16xf32>
    %14 = arith.negf %13 : vector<13x16xf32>
    %15 = math.exp %14 : vector<13x16xf32>
    %cst_8 = arith.constant 1.000000e+00 : f32
    %16 = vector.broadcast %cst_8 : f32 to vector<13x16xf32>
    %17 = arith.addf %16, %15 : vector<13x16xf32>
    %18 = arith.divf %16, %17 : vector<13x16xf32>
    %19 = arith.mulf %7, %18 : vector<13x16xf32>
    %c0_9 = arith.constant 0 : index
    %c0_10 = arith.constant 0 : index
    %c0_11 = arith.constant 0 : index
    %20 = vector.load %arg4[%c0_9, %c0_10, %c0_11] : memref<4x13x1xf32, #tpu.memory_space<vmem>>, vector<1x13x1xf32>
    %21 = vector.shape_cast %20 : vector<1x13x1xf32> to vector<13x1xf32>
    %22 = vector.broadcast %21 : vector<13x1xf32> to vector<13x16xf32>
    %23 = arith.subf %19, %22 : vector<13x16xf32>
    %c0_12 = arith.constant 0 : index
    %c0_13 = arith.constant 0 : index
    %c0_14 = arith.constant 0 : index
    %24 = vector.load %arg5[%c0_12, %c0_13, %c0_14] : memref<4x13x1xf32, #tpu.memory_space<vmem>>, vector<1x13x1xf32>
    %25 = vector.shape_cast %24 : vector<1x13x1xf32> to vector<13x1xf32>
    %cst_15 = arith.constant 9.99999974E-6 : f32
    %26 = vector.broadcast %cst_15 : f32 to vector<13x1xf32>
    %27 = arith.addf %25, %26 : vector<13x1xf32>
    %28 = math.sqrt %27 : vector<13x1xf32>
    %29 = vector.broadcast %28 : vector<13x1xf32> to vector<13x16xf32>
    %30 = arith.divf %23, %29 : vector<13x16xf32>
    %c0_16 = arith.constant 0 : index
    %c0_17 = arith.constant 0 : index
    %c0_18 = arith.constant 0 : index
    %31 = vector.load %arg6[%c0_16, %c0_17, %c0_18] : memref<4x13x13xf32, #tpu.memory_space<vmem>>, vector<1x13x13xf32>
    %32 = vector.shape_cast %31 : vector<1x13x13xf32> to vector<13x13xf32>
    %33 = vector.extract_strided_slice %32 {offsets = [0, 0], sizes = [13, 1], strides = [1, 1]} : vector<13x13xf32> to vector<13x1xf32>
    %34 = vector.extract_strided_slice %30 {offsets = [0, 0], sizes = [1, 16], strides = [1, 1]} : vector<13x16xf32> to vector<1x16xf32>
    %35 = vector.broadcast %33 : vector<13x1xf32> to vector<13x16xf32>
    %36 = vector.broadcast %34 : vector<1x16xf32> to vector<13x16xf32>
    %37 = arith.mulf %35, %36 : vector<13x16xf32>
    %38 = vector.extract_strided_slice %32 {offsets = [0, 1], sizes = [13, 1], strides = [1, 1]} : vector<13x13xf32> to vector<13x1xf32>
    %39 = vector.extract_strided_slice %30 {offsets = [1, 0], sizes = [1, 16], strides = [1, 1]} : vector<13x16xf32> to vector<1x16xf32>
    %40 = vector.broadcast %38 : vector<13x1xf32> to vector<13x16xf32>
    %41 = vector.broadcast %39 : vector<1x16xf32> to vector<13x16xf32>
    %42 = arith.mulf %40, %41 : vector<13x16xf32>
    %43 = arith.addf %37, %42 : vector<13x16xf32>
    %44 = vector.extract_strided_slice %32 {offsets = [0, 2], sizes = [13, 1], strides = [1, 1]} : vector<13x13xf32> to vector<13x1xf32>
    %45 = vector.extract_strided_slice %30 {offsets = [2, 0], sizes = [1, 16], strides = [1, 1]} : vector<13x16xf32> to vector<1x16xf32>
    %46 = vector.broadcast %44 : vector<13x1xf32> to vector<13x16xf32>
    %47 = vector.broadcast %45 : vector<1x16xf32> to vector<13x16xf32>
    %48 = arith.mulf %46, %47 : vector<13x16xf32>
    %49 = arith.addf %43, %48 : vector<13x16xf32>
    %50 = vector.extract_strided_slice %32 {offsets = [0, 3], sizes = [13, 1], strides = [1, 1]} : vector<13x13xf32> to vector<13x1xf32>
    %51 = vector.extract_strided_slice %30 {offsets = [3, 0], sizes = [1, 16], strides = [1, 1]} : vector<13x16xf32> to vector<1x16xf32>
    %52 = vector.broadcast %50 : vector<13x1xf32> to vector<13x16xf32>
    %53 = vector.broadcast %51 : vector<1x16xf32> to vector<13x16xf32>
    %54 = arith.mulf %52, %53 : vector<13x16xf32>
    %55 = arith.addf %49, %54 : vector<13x16xf32>
    %56 = vector.extract_strided_slice %32 {offsets = [0, 4], sizes = [13, 1], strides = [1, 1]} : vector<13x13xf32> to vector<13x1xf32>
    %57 = vector.extract_strided_slice %30 {offsets = [4, 0], sizes = [1, 16], strides = [1, 1]} : vector<13x16xf32> to vector<1x16xf32>
    %58 = vector.broadcast %56 : vector<13x1xf32> to vector<13x16xf32>
    %59 = vector.broadcast %57 : vector<1x16xf32> to vector<13x16xf32>
    %60 = arith.mulf %58, %59 : vector<13x16xf32>
    %61 = arith.addf %55, %60 : vector<13x16xf32>
    %62 = vector.extract_strided_slice %32 {offsets = [0, 5], sizes = [13, 1], strides = [1, 1]} : vector<13x13xf32> to vector<13x1xf32>
    %63 = vector.extract_strided_slice %30 {offsets = [5, 0], sizes = [1, 16], strides = [1, 1]} : vector<13x16xf32> to vector<1x16xf32>
    %64 = vector.broadcast %62 : vector<13x1xf32> to vector<13x16xf32>
    %65 = vector.broadcast %63 : vector<1x16xf32> to vector<13x16xf32>
    %66 = arith.mulf %64, %65 : vector<13x16xf32>
    %67 = arith.addf %61, %66 : vector<13x16xf32>
    %68 = vector.extract_strided_slice %32 {offsets = [0, 6], sizes = [13, 1], strides = [1, 1]} : vector<13x13xf32> to vector<13x1xf32>
    %69 = vector.extract_strided_slice %30 {offsets = [6, 0], sizes = [1, 16], strides = [1, 1]} : vector<13x16xf32> to vector<1x16xf32>
    %70 = vector.broadcast %68 : vector<13x1xf32> to vector<13x16xf32>
    %71 = vector.broadcast %69 : vector<1x16xf32> to vector<13x16xf32>
    %72 = arith.mulf %70, %71 : vector<13x16xf32>
    %73 = arith.addf %67, %72 : vector<13x16xf32>
    %74 = vector.extract_strided_slice %32 {offsets = [0, 7], sizes = [13, 1], strides = [1, 1]} : vector<13x13xf32> to vector<13x1xf32>
    %75 = vector.extract_strided_slice %30 {offsets = [7, 0], sizes = [1, 16], strides = [1, 1]} : vector<13x16xf32> to vector<1x16xf32>
    %76 = vector.broadcast %74 : vector<13x1xf32> to vector<13x16xf32>
    %77 = vector.broadcast %75 : vector<1x16xf32> to vector<13x16xf32>
    %78 = arith.mulf %76, %77 : vector<13x16xf32>
    %79 = arith.addf %73, %78 : vector<13x16xf32>
    %80 = vector.extract_strided_slice %32 {offsets = [0, 8], sizes = [13, 1], strides = [1, 1]} : vector<13x13xf32> to vector<13x1xf32>
    %81 = vector.extract_strided_slice %30 {offsets = [8, 0], sizes = [1, 16], strides = [1, 1]} : vector<13x16xf32> to vector<1x16xf32>
    %82 = vector.broadcast %80 : vector<13x1xf32> to vector<13x16xf32>
    %83 = vector.broadcast %81 : vector<1x16xf32> to vector<13x16xf32>
    %84 = arith.mulf %82, %83 : vector<13x16xf32>
    %85 = arith.addf %79, %84 : vector<13x16xf32>
    %86 = vector.extract_strided_slice %32 {offsets = [0, 9], sizes = [13, 1], strides = [1, 1]} : vector<13x13xf32> to vector<13x1xf32>
    %87 = vector.extract_strided_slice %30 {offsets = [9, 0], sizes = [1, 16], strides = [1, 1]} : vector<13x16xf32> to vector<1x16xf32>
    %88 = vector.broadcast %86 : vector<13x1xf32> to vector<13x16xf32>
    %89 = vector.broadcast %87 : vector<1x16xf32> to vector<13x16xf32>
    %90 = arith.mulf %88, %89 : vector<13x16xf32>
    %91 = arith.addf %85, %90 : vector<13x16xf32>
    %92 = vector.extract_strided_slice %32 {offsets = [0, 10], sizes = [13, 1], strides = [1, 1]} : vector<13x13xf32> to vector<13x1xf32>
    %93 = vector.extract_strided_slice %30 {offsets = [10, 0], sizes = [1, 16], strides = [1, 1]} : vector<13x16xf32> to vector<1x16xf32>
    %94 = vector.broadcast %92 : vector<13x1xf32> to vector<13x16xf32>
    %95 = vector.broadcast %93 : vector<1x16xf32> to vector<13x16xf32>
    %96 = arith.mulf %94, %95 : vector<13x16xf32>
    %97 = arith.addf %91, %96 : vector<13x16xf32>
    %98 = vector.extract_strided_slice %32 {offsets = [0, 11], sizes = [13, 1], strides = [1, 1]} : vector<13x13xf32> to vector<13x1xf32>
    %99 = vector.extract_strided_slice %30 {offsets = [11, 0], sizes = [1, 16], strides = [1, 1]} : vector<13x16xf32> to vector<1x16xf32>
    %100 = vector.broadcast %98 : vector<13x1xf32> to vector<13x16xf32>
    %101 = vector.broadcast %99 : vector<1x16xf32> to vector<13x16xf32>
    %102 = arith.mulf %100, %101 : vector<13x16xf32>
    %103 = arith.addf %97, %102 : vector<13x16xf32>
    %104 = vector.extract_strided_slice %32 {offsets = [0, 12], sizes = [13, 1], strides = [1, 1]} : vector<13x13xf32> to vector<13x1xf32>
    %105 = vector.extract_strided_slice %30 {offsets = [12, 0], sizes = [1, 16], strides = [1, 1]} : vector<13x16xf32> to vector<1x16xf32>
    %106 = vector.broadcast %104 : vector<13x1xf32> to vector<13x16xf32>
    %107 = vector.broadcast %105 : vector<1x16xf32> to vector<13x16xf32>
    %108 = arith.mulf %106, %107 : vector<13x16xf32>
    %109 = arith.addf %103, %108 : vector<13x16xf32>
    %c0_19 = arith.constant 0 : index
    %c0_20 = arith.constant 0 : index
    %c0_21 = arith.constant 0 : index
    %110 = vector.load %arg7[%c0_19, %c0_20, %c0_21] : memref<4x13x1xf32, #tpu.memory_space<vmem>>, vector<1x13x1xf32>
    %111 = vector.shape_cast %110 : vector<1x13x1xf32> to vector<13x1xf32>
    %112 = vector.broadcast %111 : vector<13x1xf32> to vector<13x16xf32>
    %113 = arith.addf %109, %112 : vector<13x16xf32>
    %c1 = arith.constant 1 : index
    %c0_22 = arith.constant 0 : index
    %c0_23 = arith.constant 0 : index
    %114 = vector.load %arg3[%c1, %c0_22, %c0_23] : memref<4x13x1xf32, #tpu.memory_space<vmem>>, vector<1x13x1xf32>
    %115 = vector.shape_cast %114 : vector<1x13x1xf32> to vector<13x1xf32>
    %cst_24 = arith.constant 1.000000e+00 : f32
    %116 = vector.broadcast %cst_24 : f32 to vector<13x1xf32>
    %117 = arith.addf %116, %115 : vector<13x1xf32>
    %118 = vector.broadcast %117 : vector<13x1xf32> to vector<13x16xf32>
    %119 = arith.mulf %118, %113 : vector<13x16xf32>
    %120 = arith.negf %119 : vector<13x16xf32>
    %121 = math.exp %120 : vector<13x16xf32>
    %cst_25 = arith.constant 1.000000e+00 : f32
    %122 = vector.broadcast %cst_25 : f32 to vector<13x16xf32>
    %123 = arith.addf %122, %121 : vector<13x16xf32>
    %124 = arith.divf %122, %123 : vector<13x16xf32>
    %125 = arith.mulf %113, %124 : vector<13x16xf32>
    %c1_26 = arith.constant 1 : index
    %c0_27 = arith.constant 0 : index
    %c0_28 = arith.constant 0 : index
    %126 = vector.load %arg4[%c1_26, %c0_27, %c0_28] : memref<4x13x1xf32, #tpu.memory_space<vmem>>, vector<1x13x1xf32>
    %127 = vector.shape_cast %126 : vector<1x13x1xf32> to vector<13x1xf32>
    %128 = vector.broadcast %127 : vector<13x1xf32> to vector<13x16xf32>
    %129 = arith.subf %125, %128 : vector<13x16xf32>
    %c1_29 = arith.constant 1 : index
    %c0_30 = arith.constant 0 : index
    %c0_31 = arith.constant 0 : index
    %130 = vector.load %arg5[%c1_29, %c0_30, %c0_31] : memref<4x13x1xf32, #tpu.memory_space<vmem>>, vector<1x13x1xf32>
    %131 = vector.shape_cast %130 : vector<1x13x1xf32> to vector<13x1xf32>
    %cst_32 = arith.constant 9.99999974E-6 : f32
    %132 = vector.broadcast %cst_32 : f32 to vector<13x1xf32>
    %133 = arith.addf %131, %132 : vector<13x1xf32>
    %134 = math.sqrt %133 : vector<13x1xf32>
    %135 = vector.broadcast %134 : vector<13x1xf32> to vector<13x16xf32>
    %136 = arith.divf %129, %135 : vector<13x16xf32>
    %c1_33 = arith.constant 1 : index
    %c0_34 = arith.constant 0 : index
    %c0_35 = arith.constant 0 : index
    %137 = vector.load %arg6[%c1_33, %c0_34, %c0_35] : memref<4x13x13xf32, #tpu.memory_space<vmem>>, vector<1x13x13xf32>
    %138 = vector.shape_cast %137 : vector<1x13x13xf32> to vector<13x13xf32>
    %139 = vector.extract_strided_slice %138 {offsets = [0, 0], sizes = [13, 1], strides = [1, 1]} : vector<13x13xf32> to vector<13x1xf32>
    %140 = vector.extract_strided_slice %136 {offsets = [0, 0], sizes = [1, 16], strides = [1, 1]} : vector<13x16xf32> to vector<1x16xf32>
    %141 = vector.broadcast %139 : vector<13x1xf32> to vector<13x16xf32>
    %142 = vector.broadcast %140 : vector<1x16xf32> to vector<13x16xf32>
    %143 = arith.mulf %141, %142 : vector<13x16xf32>
    %144 = vector.extract_strided_slice %138 {offsets = [0, 1], sizes = [13, 1], strides = [1, 1]} : vector<13x13xf32> to vector<13x1xf32>
    %145 = vector.extract_strided_slice %136 {offsets = [1, 0], sizes = [1, 16], strides = [1, 1]} : vector<13x16xf32> to vector<1x16xf32>
    %146 = vector.broadcast %144 : vector<13x1xf32> to vector<13x16xf32>
    %147 = vector.broadcast %145 : vector<1x16xf32> to vector<13x16xf32>
    %148 = arith.mulf %146, %147 : vector<13x16xf32>
    %149 = arith.addf %143, %148 : vector<13x16xf32>
    %150 = vector.extract_strided_slice %138 {offsets = [0, 2], sizes = [13, 1], strides = [1, 1]} : vector<13x13xf32> to vector<13x1xf32>
    %151 = vector.extract_strided_slice %136 {offsets = [2, 0], sizes = [1, 16], strides = [1, 1]} : vector<13x16xf32> to vector<1x16xf32>
    %152 = vector.broadcast %150 : vector<13x1xf32> to vector<13x16xf32>
    %153 = vector.broadcast %151 : vector<1x16xf32> to vector<13x16xf32>
    %154 = arith.mulf %152, %153 : vector<13x16xf32>
    %155 = arith.addf %149, %154 : vector<13x16xf32>
    %156 = vector.extract_strided_slice %138 {offsets = [0, 3], sizes = [13, 1], strides = [1, 1]} : vector<13x13xf32> to vector<13x1xf32>
    %157 = vector.extract_strided_slice %136 {offsets = [3, 0], sizes = [1, 16], strides = [1, 1]} : vector<13x16xf32> to vector<1x16xf32>
    %158 = vector.broadcast %156 : vector<13x1xf32> to vector<13x16xf32>
    %159 = vector.broadcast %157 : vector<1x16xf32> to vector<13x16xf32>
    %160 = arith.mulf %158, %159 : vector<13x16xf32>
    %161 = arith.addf %155, %160 : vector<13x16xf32>
    %162 = vector.extract_strided_slice %138 {offsets = [0, 4], sizes = [13, 1], strides = [1, 1]} : vector<13x13xf32> to vector<13x1xf32>
    %163 = vector.extract_strided_slice %136 {offsets = [4, 0], sizes = [1, 16], strides = [1, 1]} : vector<13x16xf32> to vector<1x16xf32>
    %164 = vector.broadcast %162 : vector<13x1xf32> to vector<13x16xf32>
    %165 = vector.broadcast %163 : vector<1x16xf32> to vector<13x16xf32>
    %166 = arith.mulf %164, %165 : vector<13x16xf32>
    %167 = arith.addf %161, %166 : vector<13x16xf32>
    %168 = vector.extract_strided_slice %138 {offsets = [0, 5], sizes = [13, 1], strides = [1, 1]} : vector<13x13xf32> to vector<13x1xf32>
    %169 = vector.extract_strided_slice %136 {offsets = [5, 0], sizes = [1, 16], strides = [1, 1]} : vector<13x16xf32> to vector<1x16xf32>
    %170 = vector.broadcast %168 : vector<13x1xf32> to vector<13x16xf32>
    %171 = vector.broadcast %169 : vector<1x16xf32> to vector<13x16xf32>
    %172 = arith.mulf %170, %171 : vector<13x16xf32>
    %173 = arith.addf %167, %172 : vector<13x16xf32>
    %174 = vector.extract_strided_slice %138 {offsets = [0, 6], sizes = [13, 1], strides = [1, 1]} : vector<13x13xf32> to vector<13x1xf32>
    %175 = vector.extract_strided_slice %136 {offsets = [6, 0], sizes = [1, 16], strides = [1, 1]} : vector<13x16xf32> to vector<1x16xf32>
    %176 = vector.broadcast %174 : vector<13x1xf32> to vector<13x16xf32>
    %177 = vector.broadcast %175 : vector<1x16xf32> to vector<13x16xf32>
    %178 = arith.mulf %176, %177 : vector<13x16xf32>
    %179 = arith.addf %173, %178 : vector<13x16xf32>
    %180 = vector.extract_strided_slice %138 {offsets = [0, 7], sizes = [13, 1], strides = [1, 1]} : vector<13x13xf32> to vector<13x1xf32>
    %181 = vector.extract_strided_slice %136 {offsets = [7, 0], sizes = [1, 16], strides = [1, 1]} : vector<13x16xf32> to vector<1x16xf32>
    %182 = vector.broadcast %180 : vector<13x1xf32> to vector<13x16xf32>
    %183 = vector.broadcast %181 : vector<1x16xf32> to vector<13x16xf32>
    %184 = arith.mulf %182, %183 : vector<13x16xf32>
    %185 = arith.addf %179, %184 : vector<13x16xf32>
    %186 = vector.extract_strided_slice %138 {offsets = [0, 8], sizes = [13, 1], strides = [1, 1]} : vector<13x13xf32> to vector<13x1xf32>
    %187 = vector.extract_strided_slice %136 {offsets = [8, 0], sizes = [1, 16], strides = [1, 1]} : vector<13x16xf32> to vector<1x16xf32>
    %188 = vector.broadcast %186 : vector<13x1xf32> to vector<13x16xf32>
    %189 = vector.broadcast %187 : vector<1x16xf32> to vector<13x16xf32>
    %190 = arith.mulf %188, %189 : vector<13x16xf32>
    %191 = arith.addf %185, %190 : vector<13x16xf32>
    %192 = vector.extract_strided_slice %138 {offsets = [0, 9], sizes = [13, 1], strides = [1, 1]} : vector<13x13xf32> to vector<13x1xf32>
    %193 = vector.extract_strided_slice %136 {offsets = [9, 0], sizes = [1, 16], strides = [1, 1]} : vector<13x16xf32> to vector<1x16xf32>
    %194 = vector.broadcast %192 : vector<13x1xf32> to vector<13x16xf32>
    %195 = vector.broadcast %193 : vector<1x16xf32> to vector<13x16xf32>
    %196 = arith.mulf %194, %195 : vector<13x16xf32>
    %197 = arith.addf %191, %196 : vector<13x16xf32>
    %198 = vector.extract_strided_slice %138 {offsets = [0, 10], sizes = [13, 1], strides = [1, 1]} : vector<13x13xf32> to vector<13x1xf32>
    %199 = vector.extract_strided_slice %136 {offsets = [10, 0], sizes = [1, 16], strides = [1, 1]} : vector<13x16xf32> to vector<1x16xf32>
    %200 = vector.broadcast %198 : vector<13x1xf32> to vector<13x16xf32>
    %201 = vector.broadcast %199 : vector<1x16xf32> to vector<13x16xf32>
    %202 = arith.mulf %200, %201 : vector<13x16xf32>
    %203 = arith.addf %197, %202 : vector<13x16xf32>
    %204 = vector.extract_strided_slice %138 {offsets = [0, 11], sizes = [13, 1], strides = [1, 1]} : vector<13x13xf32> to vector<13x1xf32>
    %205 = vector.extract_strided_slice %136 {offsets = [11, 0], sizes = [1, 16], strides = [1, 1]} : vector<13x16xf32> to vector<1x16xf32>
    %206 = vector.broadcast %204 : vector<13x1xf32> to vector<13x16xf32>
    %207 = vector.broadcast %205 : vector<1x16xf32> to vector<13x16xf32>
    %208 = arith.mulf %206, %207 : vector<13x16xf32>
    %209 = arith.addf %203, %208 : vector<13x16xf32>
    %210 = vector.extract_strided_slice %138 {offsets = [0, 12], sizes = [13, 1], strides = [1, 1]} : vector<13x13xf32> to vector<13x1xf32>
    %211 = vector.extract_strided_slice %136 {offsets = [12, 0], sizes = [1, 16], strides = [1, 1]} : vector<13x16xf32> to vector<1x16xf32>
    %212 = vector.broadcast %210 : vector<13x1xf32> to vector<13x16xf32>
    %213 = vector.broadcast %211 : vector<1x16xf32> to vector<13x16xf32>
    %214 = arith.mulf %212, %213 : vector<13x16xf32>
    %215 = arith.addf %209, %214 : vector<13x16xf32>
    %c1_36 = arith.constant 1 : index
    %c0_37 = arith.constant 0 : index
    %c0_38 = arith.constant 0 : index
    %216 = vector.load %arg7[%c1_36, %c0_37, %c0_38] : memref<4x13x1xf32, #tpu.memory_space<vmem>>, vector<1x13x1xf32>
    %217 = vector.shape_cast %216 : vector<1x13x1xf32> to vector<13x1xf32>
    %218 = vector.broadcast %217 : vector<13x1xf32> to vector<13x16xf32>
    %219 = arith.addf %215, %218 : vector<13x16xf32>
    %c2 = arith.constant 2 : index
    %c0_39 = arith.constant 0 : index
    %c0_40 = arith.constant 0 : index
    %220 = vector.load %arg3[%c2, %c0_39, %c0_40] : memref<4x13x1xf32, #tpu.memory_space<vmem>>, vector<1x13x1xf32>
    %221 = vector.shape_cast %220 : vector<1x13x1xf32> to vector<13x1xf32>
    %cst_41 = arith.constant 1.000000e+00 : f32
    %222 = vector.broadcast %cst_41 : f32 to vector<13x1xf32>
    %223 = arith.addf %222, %221 : vector<13x1xf32>
    %224 = vector.broadcast %223 : vector<13x1xf32> to vector<13x16xf32>
    %225 = arith.mulf %224, %219 : vector<13x16xf32>
    %226 = arith.negf %225 : vector<13x16xf32>
    %227 = math.exp %226 : vector<13x16xf32>
    %cst_42 = arith.constant 1.000000e+00 : f32
    %228 = vector.broadcast %cst_42 : f32 to vector<13x16xf32>
    %229 = arith.addf %228, %227 : vector<13x16xf32>
    %230 = arith.divf %228, %229 : vector<13x16xf32>
    %231 = arith.mulf %219, %230 : vector<13x16xf32>
    %c2_43 = arith.constant 2 : index
    %c0_44 = arith.constant 0 : index
    %c0_45 = arith.constant 0 : index
    %232 = vector.load %arg4[%c2_43, %c0_44, %c0_45] : memref<4x13x1xf32, #tpu.memory_space<vmem>>, vector<1x13x1xf32>
    %233 = vector.shape_cast %232 : vector<1x13x1xf32> to vector<13x1xf32>
    %234 = vector.broadcast %233 : vector<13x1xf32> to vector<13x16xf32>
    %235 = arith.subf %231, %234 : vector<13x16xf32>
    %c2_46 = arith.constant 2 : index
    %c0_47 = arith.constant 0 : index
    %c0_48 = arith.constant 0 : index
    %236 = vector.load %arg5[%c2_46, %c0_47, %c0_48] : memref<4x13x1xf32, #tpu.memory_space<vmem>>, vector<1x13x1xf32>
    %237 = vector.shape_cast %236 : vector<1x13x1xf32> to vector<13x1xf32>
    %cst_49 = arith.constant 9.99999974E-6 : f32
    %238 = vector.broadcast %cst_49 : f32 to vector<13x1xf32>
    %239 = arith.addf %237, %238 : vector<13x1xf32>
    %240 = math.sqrt %239 : vector<13x1xf32>
    %241 = vector.broadcast %240 : vector<13x1xf32> to vector<13x16xf32>
    %242 = arith.divf %235, %241 : vector<13x16xf32>
    %c2_50 = arith.constant 2 : index
    %c0_51 = arith.constant 0 : index
    %c0_52 = arith.constant 0 : index
    %243 = vector.load %arg6[%c2_50, %c0_51, %c0_52] : memref<4x13x13xf32, #tpu.memory_space<vmem>>, vector<1x13x13xf32>
    %244 = vector.shape_cast %243 : vector<1x13x13xf32> to vector<13x13xf32>
    %245 = vector.extract_strided_slice %244 {offsets = [0, 0], sizes = [13, 1], strides = [1, 1]} : vector<13x13xf32> to vector<13x1xf32>
    %246 = vector.extract_strided_slice %242 {offsets = [0, 0], sizes = [1, 16], strides = [1, 1]} : vector<13x16xf32> to vector<1x16xf32>
    %247 = vector.broadcast %245 : vector<13x1xf32> to vector<13x16xf32>
    %248 = vector.broadcast %246 : vector<1x16xf32> to vector<13x16xf32>
    %249 = arith.mulf %247, %248 : vector<13x16xf32>
    %250 = vector.extract_strided_slice %244 {offsets = [0, 1], sizes = [13, 1], strides = [1, 1]} : vector<13x13xf32> to vector<13x1xf32>
    %251 = vector.extract_strided_slice %242 {offsets = [1, 0], sizes = [1, 16], strides = [1, 1]} : vector<13x16xf32> to vector<1x16xf32>
    %252 = vector.broadcast %250 : vector<13x1xf32> to vector<13x16xf32>
    %253 = vector.broadcast %251 : vector<1x16xf32> to vector<13x16xf32>
    %254 = arith.mulf %252, %253 : vector<13x16xf32>
    %255 = arith.addf %249, %254 : vector<13x16xf32>
    %256 = vector.extract_strided_slice %244 {offsets = [0, 2], sizes = [13, 1], strides = [1, 1]} : vector<13x13xf32> to vector<13x1xf32>
    %257 = vector.extract_strided_slice %242 {offsets = [2, 0], sizes = [1, 16], strides = [1, 1]} : vector<13x16xf32> to vector<1x16xf32>
    %258 = vector.broadcast %256 : vector<13x1xf32> to vector<13x16xf32>
    %259 = vector.broadcast %257 : vector<1x16xf32> to vector<13x16xf32>
    %260 = arith.mulf %258, %259 : vector<13x16xf32>
    %261 = arith.addf %255, %260 : vector<13x16xf32>
    %262 = vector.extract_strided_slice %244 {offsets = [0, 3], sizes = [13, 1], strides = [1, 1]} : vector<13x13xf32> to vector<13x1xf32>
    %263 = vector.extract_strided_slice %242 {offsets = [3, 0], sizes = [1, 16], strides = [1, 1]} : vector<13x16xf32> to vector<1x16xf32>
    %264 = vector.broadcast %262 : vector<13x1xf32> to vector<13x16xf32>
    %265 = vector.broadcast %263 : vector<1x16xf32> to vector<13x16xf32>
    %266 = arith.mulf %264, %265 : vector<13x16xf32>
    %267 = arith.addf %261, %266 : vector<13x16xf32>
    %268 = vector.extract_strided_slice %244 {offsets = [0, 4], sizes = [13, 1], strides = [1, 1]} : vector<13x13xf32> to vector<13x1xf32>
    %269 = vector.extract_strided_slice %242 {offsets = [4, 0], sizes = [1, 16], strides = [1, 1]} : vector<13x16xf32> to vector<1x16xf32>
    %270 = vector.broadcast %268 : vector<13x1xf32> to vector<13x16xf32>
    %271 = vector.broadcast %269 : vector<1x16xf32> to vector<13x16xf32>
    %272 = arith.mulf %270, %271 : vector<13x16xf32>
    %273 = arith.addf %267, %272 : vector<13x16xf32>
    %274 = vector.extract_strided_slice %244 {offsets = [0, 5], sizes = [13, 1], strides = [1, 1]} : vector<13x13xf32> to vector<13x1xf32>
    %275 = vector.extract_strided_slice %242 {offsets = [5, 0], sizes = [1, 16], strides = [1, 1]} : vector<13x16xf32> to vector<1x16xf32>
    %276 = vector.broadcast %274 : vector<13x1xf32> to vector<13x16xf32>
    %277 = vector.broadcast %275 : vector<1x16xf32> to vector<13x16xf32>
    %278 = arith.mulf %276, %277 : vector<13x16xf32>
    %279 = arith.addf %273, %278 : vector<13x16xf32>
    %280 = vector.extract_strided_slice %244 {offsets = [0, 6], sizes = [13, 1], strides = [1, 1]} : vector<13x13xf32> to vector<13x1xf32>
    %281 = vector.extract_strided_slice %242 {offsets = [6, 0], sizes = [1, 16], strides = [1, 1]} : vector<13x16xf32> to vector<1x16xf32>
    %282 = vector.broadcast %280 : vector<13x1xf32> to vector<13x16xf32>
    %283 = vector.broadcast %281 : vector<1x16xf32> to vector<13x16xf32>
    %284 = arith.mulf %282, %283 : vector<13x16xf32>
    %285 = arith.addf %279, %284 : vector<13x16xf32>
    %286 = vector.extract_strided_slice %244 {offsets = [0, 7], sizes = [13, 1], strides = [1, 1]} : vector<13x13xf32> to vector<13x1xf32>
    %287 = vector.extract_strided_slice %242 {offsets = [7, 0], sizes = [1, 16], strides = [1, 1]} : vector<13x16xf32> to vector<1x16xf32>
    %288 = vector.broadcast %286 : vector<13x1xf32> to vector<13x16xf32>
    %289 = vector.broadcast %287 : vector<1x16xf32> to vector<13x16xf32>
    %290 = arith.mulf %288, %289 : vector<13x16xf32>
    %291 = arith.addf %285, %290 : vector<13x16xf32>
    %292 = vector.extract_strided_slice %244 {offsets = [0, 8], sizes = [13, 1], strides = [1, 1]} : vector<13x13xf32> to vector<13x1xf32>
    %293 = vector.extract_strided_slice %242 {offsets = [8, 0], sizes = [1, 16], strides = [1, 1]} : vector<13x16xf32> to vector<1x16xf32>
    %294 = vector.broadcast %292 : vector<13x1xf32> to vector<13x16xf32>
    %295 = vector.broadcast %293 : vector<1x16xf32> to vector<13x16xf32>
    %296 = arith.mulf %294, %295 : vector<13x16xf32>
    %297 = arith.addf %291, %296 : vector<13x16xf32>
    %298 = vector.extract_strided_slice %244 {offsets = [0, 9], sizes = [13, 1], strides = [1, 1]} : vector<13x13xf32> to vector<13x1xf32>
    %299 = vector.extract_strided_slice %242 {offsets = [9, 0], sizes = [1, 16], strides = [1, 1]} : vector<13x16xf32> to vector<1x16xf32>
    %300 = vector.broadcast %298 : vector<13x1xf32> to vector<13x16xf32>
    %301 = vector.broadcast %299 : vector<1x16xf32> to vector<13x16xf32>
    %302 = arith.mulf %300, %301 : vector<13x16xf32>
    %303 = arith.addf %297, %302 : vector<13x16xf32>
    %304 = vector.extract_strided_slice %244 {offsets = [0, 10], sizes = [13, 1], strides = [1, 1]} : vector<13x13xf32> to vector<13x1xf32>
    %305 = vector.extract_strided_slice %242 {offsets = [10, 0], sizes = [1, 16], strides = [1, 1]} : vector<13x16xf32> to vector<1x16xf32>
    %306 = vector.broadcast %304 : vector<13x1xf32> to vector<13x16xf32>
    %307 = vector.broadcast %305 : vector<1x16xf32> to vector<13x16xf32>
    %308 = arith.mulf %306, %307 : vector<13x16xf32>
    %309 = arith.addf %303, %308 : vector<13x16xf32>
    %310 = vector.extract_strided_slice %244 {offsets = [0, 11], sizes = [13, 1], strides = [1, 1]} : vector<13x13xf32> to vector<13x1xf32>
    %311 = vector.extract_strided_slice %242 {offsets = [11, 0], sizes = [1, 16], strides = [1, 1]} : vector<13x16xf32> to vector<1x16xf32>
    %312 = vector.broadcast %310 : vector<13x1xf32> to vector<13x16xf32>
    %313 = vector.broadcast %311 : vector<1x16xf32> to vector<13x16xf32>
    %314 = arith.mulf %312, %313 : vector<13x16xf32>
    %315 = arith.addf %309, %314 : vector<13x16xf32>
    %316 = vector.extract_strided_slice %244 {offsets = [0, 12], sizes = [13, 1], strides = [1, 1]} : vector<13x13xf32> to vector<13x1xf32>
    %317 = vector.extract_strided_slice %242 {offsets = [12, 0], sizes = [1, 16], strides = [1, 1]} : vector<13x16xf32> to vector<1x16xf32>
    %318 = vector.broadcast %316 : vector<13x1xf32> to vector<13x16xf32>
    %319 = vector.broadcast %317 : vector<1x16xf32> to vector<13x16xf32>
    %320 = arith.mulf %318, %319 : vector<13x16xf32>
    %321 = arith.addf %315, %320 : vector<13x16xf32>
    %c2_53 = arith.constant 2 : index
    %c0_54 = arith.constant 0 : index
    %c0_55 = arith.constant 0 : index
    %322 = vector.load %arg7[%c2_53, %c0_54, %c0_55] : memref<4x13x1xf32, #tpu.memory_space<vmem>>, vector<1x13x1xf32>
    %323 = vector.shape_cast %322 : vector<1x13x1xf32> to vector<13x1xf32>
    %324 = vector.broadcast %323 : vector<13x1xf32> to vector<13x16xf32>
    %325 = arith.addf %321, %324 : vector<13x16xf32>
    %c3 = arith.constant 3 : index
    %c0_56 = arith.constant 0 : index
    %c0_57 = arith.constant 0 : index
    %326 = vector.load %arg3[%c3, %c0_56, %c0_57] : memref<4x13x1xf32, #tpu.memory_space<vmem>>, vector<1x13x1xf32>
    %327 = vector.shape_cast %326 : vector<1x13x1xf32> to vector<13x1xf32>
    %cst_58 = arith.constant 1.000000e+00 : f32
    %328 = vector.broadcast %cst_58 : f32 to vector<13x1xf32>
    %329 = arith.addf %328, %327 : vector<13x1xf32>
    %330 = vector.broadcast %329 : vector<13x1xf32> to vector<13x16xf32>
    %331 = arith.mulf %330, %325 : vector<13x16xf32>
    %332 = arith.negf %331 : vector<13x16xf32>
    %333 = math.exp %332 : vector<13x16xf32>
    %cst_59 = arith.constant 1.000000e+00 : f32
    %334 = vector.broadcast %cst_59 : f32 to vector<13x16xf32>
    %335 = arith.addf %334, %333 : vector<13x16xf32>
    %336 = arith.divf %334, %335 : vector<13x16xf32>
    %337 = arith.mulf %325, %336 : vector<13x16xf32>
    %c3_60 = arith.constant 3 : index
    %c0_61 = arith.constant 0 : index
    %c0_62 = arith.constant 0 : index
    %338 = vector.load %arg4[%c3_60, %c0_61, %c0_62] : memref<4x13x1xf32, #tpu.memory_space<vmem>>, vector<1x13x1xf32>
    %339 = vector.shape_cast %338 : vector<1x13x1xf32> to vector<13x1xf32>
    %340 = vector.broadcast %339 : vector<13x1xf32> to vector<13x16xf32>
    %341 = arith.subf %337, %340 : vector<13x16xf32>
    %c3_63 = arith.constant 3 : index
    %c0_64 = arith.constant 0 : index
    %c0_65 = arith.constant 0 : index
    %342 = vector.load %arg5[%c3_63, %c0_64, %c0_65] : memref<4x13x1xf32, #tpu.memory_space<vmem>>, vector<1x13x1xf32>
    %343 = vector.shape_cast %342 : vector<1x13x1xf32> to vector<13x1xf32>
    %cst_66 = arith.constant 9.99999974E-6 : f32
    %344 = vector.broadcast %cst_66 : f32 to vector<13x1xf32>
    %345 = arith.addf %343, %344 : vector<13x1xf32>
    %346 = math.sqrt %345 : vector<13x1xf32>
    %347 = vector.broadcast %346 : vector<13x1xf32> to vector<13x16xf32>
    %348 = arith.divf %341, %347 : vector<13x16xf32>
    %c3_67 = arith.constant 3 : index
    %c0_68 = arith.constant 0 : index
    %c0_69 = arith.constant 0 : index
    %349 = vector.load %arg6[%c3_67, %c0_68, %c0_69] : memref<4x13x13xf32, #tpu.memory_space<vmem>>, vector<1x13x13xf32>
    %350 = vector.shape_cast %349 : vector<1x13x13xf32> to vector<13x13xf32>
    %351 = vector.extract_strided_slice %350 {offsets = [0, 0], sizes = [13, 1], strides = [1, 1]} : vector<13x13xf32> to vector<13x1xf32>
    %352 = vector.extract_strided_slice %348 {offsets = [0, 0], sizes = [1, 16], strides = [1, 1]} : vector<13x16xf32> to vector<1x16xf32>
    %353 = vector.broadcast %351 : vector<13x1xf32> to vector<13x16xf32>
    %354 = vector.broadcast %352 : vector<1x16xf32> to vector<13x16xf32>
    %355 = arith.mulf %353, %354 : vector<13x16xf32>
    %356 = vector.extract_strided_slice %350 {offsets = [0, 1], sizes = [13, 1], strides = [1, 1]} : vector<13x13xf32> to vector<13x1xf32>
    %357 = vector.extract_strided_slice %348 {offsets = [1, 0], sizes = [1, 16], strides = [1, 1]} : vector<13x16xf32> to vector<1x16xf32>
    %358 = vector.broadcast %356 : vector<13x1xf32> to vector<13x16xf32>
    %359 = vector.broadcast %357 : vector<1x16xf32> to vector<13x16xf32>
    %360 = arith.mulf %358, %359 : vector<13x16xf32>
    %361 = arith.addf %355, %360 : vector<13x16xf32>
    %362 = vector.extract_strided_slice %350 {offsets = [0, 2], sizes = [13, 1], strides = [1, 1]} : vector<13x13xf32> to vector<13x1xf32>
    %363 = vector.extract_strided_slice %348 {offsets = [2, 0], sizes = [1, 16], strides = [1, 1]} : vector<13x16xf32> to vector<1x16xf32>
    %364 = vector.broadcast %362 : vector<13x1xf32> to vector<13x16xf32>
    %365 = vector.broadcast %363 : vector<1x16xf32> to vector<13x16xf32>
    %366 = arith.mulf %364, %365 : vector<13x16xf32>
    %367 = arith.addf %361, %366 : vector<13x16xf32>
    %368 = vector.extract_strided_slice %350 {offsets = [0, 3], sizes = [13, 1], strides = [1, 1]} : vector<13x13xf32> to vector<13x1xf32>
    %369 = vector.extract_strided_slice %348 {offsets = [3, 0], sizes = [1, 16], strides = [1, 1]} : vector<13x16xf32> to vector<1x16xf32>
    %370 = vector.broadcast %368 : vector<13x1xf32> to vector<13x16xf32>
    %371 = vector.broadcast %369 : vector<1x16xf32> to vector<13x16xf32>
    %372 = arith.mulf %370, %371 : vector<13x16xf32>
    %373 = arith.addf %367, %372 : vector<13x16xf32>
    %374 = vector.extract_strided_slice %350 {offsets = [0, 4], sizes = [13, 1], strides = [1, 1]} : vector<13x13xf32> to vector<13x1xf32>
    %375 = vector.extract_strided_slice %348 {offsets = [4, 0], sizes = [1, 16], strides = [1, 1]} : vector<13x16xf32> to vector<1x16xf32>
    %376 = vector.broadcast %374 : vector<13x1xf32> to vector<13x16xf32>
    %377 = vector.broadcast %375 : vector<1x16xf32> to vector<13x16xf32>
    %378 = arith.mulf %376, %377 : vector<13x16xf32>
    %379 = arith.addf %373, %378 : vector<13x16xf32>
    %380 = vector.extract_strided_slice %350 {offsets = [0, 5], sizes = [13, 1], strides = [1, 1]} : vector<13x13xf32> to vector<13x1xf32>
    %381 = vector.extract_strided_slice %348 {offsets = [5, 0], sizes = [1, 16], strides = [1, 1]} : vector<13x16xf32> to vector<1x16xf32>
    %382 = vector.broadcast %380 : vector<13x1xf32> to vector<13x16xf32>
    %383 = vector.broadcast %381 : vector<1x16xf32> to vector<13x16xf32>
    %384 = arith.mulf %382, %383 : vector<13x16xf32>
    %385 = arith.addf %379, %384 : vector<13x16xf32>
    %386 = vector.extract_strided_slice %350 {offsets = [0, 6], sizes = [13, 1], strides = [1, 1]} : vector<13x13xf32> to vector<13x1xf32>
    %387 = vector.extract_strided_slice %348 {offsets = [6, 0], sizes = [1, 16], strides = [1, 1]} : vector<13x16xf32> to vector<1x16xf32>
    %388 = vector.broadcast %386 : vector<13x1xf32> to vector<13x16xf32>
    %389 = vector.broadcast %387 : vector<1x16xf32> to vector<13x16xf32>
    %390 = arith.mulf %388, %389 : vector<13x16xf32>
    %391 = arith.addf %385, %390 : vector<13x16xf32>
    %392 = vector.extract_strided_slice %350 {offsets = [0, 7], sizes = [13, 1], strides = [1, 1]} : vector<13x13xf32> to vector<13x1xf32>
    %393 = vector.extract_strided_slice %348 {offsets = [7, 0], sizes = [1, 16], strides = [1, 1]} : vector<13x16xf32> to vector<1x16xf32>
    %394 = vector.broadcast %392 : vector<13x1xf32> to vector<13x16xf32>
    %395 = vector.broadcast %393 : vector<1x16xf32> to vector<13x16xf32>
    %396 = arith.mulf %394, %395 : vector<13x16xf32>
    %397 = arith.addf %391, %396 : vector<13x16xf32>
    %398 = vector.extract_strided_slice %350 {offsets = [0, 8], sizes = [13, 1], strides = [1, 1]} : vector<13x13xf32> to vector<13x1xf32>
    %399 = vector.extract_strided_slice %348 {offsets = [8, 0], sizes = [1, 16], strides = [1, 1]} : vector<13x16xf32> to vector<1x16xf32>
    %400 = vector.broadcast %398 : vector<13x1xf32> to vector<13x16xf32>
    %401 = vector.broadcast %399 : vector<1x16xf32> to vector<13x16xf32>
    %402 = arith.mulf %400, %401 : vector<13x16xf32>
    %403 = arith.addf %397, %402 : vector<13x16xf32>
    %404 = vector.extract_strided_slice %350 {offsets = [0, 9], sizes = [13, 1], strides = [1, 1]} : vector<13x13xf32> to vector<13x1xf32>
    %405 = vector.extract_strided_slice %348 {offsets = [9, 0], sizes = [1, 16], strides = [1, 1]} : vector<13x16xf32> to vector<1x16xf32>
    %406 = vector.broadcast %404 : vector<13x1xf32> to vector<13x16xf32>
    %407 = vector.broadcast %405 : vector<1x16xf32> to vector<13x16xf32>
    %408 = arith.mulf %406, %407 : vector<13x16xf32>
    %409 = arith.addf %403, %408 : vector<13x16xf32>
    %410 = vector.extract_strided_slice %350 {offsets = [0, 10], sizes = [13, 1], strides = [1, 1]} : vector<13x13xf32> to vector<13x1xf32>
    %411 = vector.extract_strided_slice %348 {offsets = [10, 0], sizes = [1, 16], strides = [1, 1]} : vector<13x16xf32> to vector<1x16xf32>
    %412 = vector.broadcast %410 : vector<13x1xf32> to vector<13x16xf32>
    %413 = vector.broadcast %411 : vector<1x16xf32> to vector<13x16xf32>
    %414 = arith.mulf %412, %413 : vector<13x16xf32>
    %415 = arith.addf %409, %414 : vector<13x16xf32>
    %416 = vector.extract_strided_slice %350 {offsets = [0, 11], sizes = [13, 1], strides = [1, 1]} : vector<13x13xf32> to vector<13x1xf32>
    %417 = vector.extract_strided_slice %348 {offsets = [11, 0], sizes = [1, 16], strides = [1, 1]} : vector<13x16xf32> to vector<1x16xf32>
    %418 = vector.broadcast %416 : vector<13x1xf32> to vector<13x16xf32>
    %419 = vector.broadcast %417 : vector<1x16xf32> to vector<13x16xf32>
    %420 = arith.mulf %418, %419 : vector<13x16xf32>
    %421 = arith.addf %415, %420 : vector<13x16xf32>
    %422 = vector.extract_strided_slice %350 {offsets = [0, 12], sizes = [13, 1], strides = [1, 1]} : vector<13x13xf32> to vector<13x1xf32>
    %423 = vector.extract_strided_slice %348 {offsets = [12, 0], sizes = [1, 16], strides = [1, 1]} : vector<13x16xf32> to vector<1x16xf32>
    %424 = vector.broadcast %422 : vector<13x1xf32> to vector<13x16xf32>
    %425 = vector.broadcast %423 : vector<1x16xf32> to vector<13x16xf32>
    %426 = arith.mulf %424, %425 : vector<13x16xf32>
    %427 = arith.addf %421, %426 : vector<13x16xf32>
    %c3_70 = arith.constant 3 : index
    %c0_71 = arith.constant 0 : index
    %c0_72 = arith.constant 0 : index
    %428 = vector.load %arg7[%c3_70, %c0_71, %c0_72] : memref<4x13x1xf32, #tpu.memory_space<vmem>>, vector<1x13x1xf32>
    %429 = vector.shape_cast %428 : vector<1x13x1xf32> to vector<13x1xf32>
    %430 = vector.broadcast %429 : vector<13x1xf32> to vector<13x16xf32>
    %431 = arith.addf %427, %430 : vector<13x16xf32>
    %cst_73 = arith.constant dense<0xFF800000> : vector<16xf32>
    %432 = vector.multi_reduction <maximumf>, %431, %cst_73 [0] : vector<13x16xf32> to vector<16xf32>
    %433 = vector.shape_cast %432 : vector<16xf32> to vector<1x16xf32>
    %434 = vector.broadcast %433 : vector<1x16xf32> to vector<13x16xf32>
    %435 = arith.subf %431, %434 : vector<13x16xf32>
    %436 = math.exp %435 : vector<13x16xf32>
    %cst_74 = arith.constant dense<0.000000e+00> : vector<16xf32>
    %437 = vector.multi_reduction <add>, %436, %cst_74 [0] : vector<13x16xf32> to vector<16xf32>
    %438 = vector.shape_cast %437 : vector<16xf32> to vector<1x16xf32>
    %439 = vector.broadcast %438 : vector<1x16xf32> to vector<13x16xf32>
    %440 = arith.divf %436, %439 : vector<13x16xf32>
    %c0_75 = arith.constant 0 : index
    %c0_76 = arith.constant 0 : index
    %441 = vector.load %arg8[%c0_75, %c0_76] : memref<13x16xf32, #tpu.memory_space<vmem>>, vector<13x16xf32>
    tpu.vector_store %arg8[%c0_75, %c0_76], %440 {strides = array<i32>} : memref<13x16xf32, #tpu.memory_space<vmem>>, vector<13x16xf32>,
    return
  }
}

</mosaic_0001>

<bundles_post_ra>
// kernel: exlayers_forward.3
= control target key start
LH: loop header
LB: loop body
LE: loop exit
PB: predicated region body
PF: predicated region fallthrough
CT: control target
= control target key end

     0   :  { %v112_v3 = vlaneseq  ;;  %v380_v4 = vmov 0.0|0.0   ;;  %vm381_vm0 = vmmov 0   ;;  %v382_v7 = vmov 0.0   ;;  %s493_s0 = inlined_call_operand.vmem [shape: f32[32,28], index: 0, kind: input, shape index: {}]   ;;  %s494_s1 = inlined_call_operand.<no memory space> [shape: f32[1], index: 1, kind: input, shape index: {}]   ;;  %s495_s2 = inlined_call_operand.vmem [shape: f32[13,16], index: 2, kind: input, shape index: {}]   ;;  %s496_s3 = inlined_call_operand.vmem [shape: f32[2,32], index: 3, kind: input, shape index: {}]   ;;  %s497_s4 = inlined_call_operand.hbm [shape: f32[2,16], index: 4, kind: output, shape index: {}]  }
   0x1   :  { %v20_v0 = vld [vmem:[%s493_s0] sm:$0xff]  ;;  %v21_v1 = vld [vmem:[%s493_s0 + $0x8] sm:$0xff]  ;;  %v22_v2 = vld [vmem:[%s493_s0 + $0x10] sm:$0xff]  ;;  %318 = vmatprep.subr.bf16.mxu0 %v380_v4  ;;  %315 = vmatprep.mubr.msk.f32.mxu0 %vm381_vm0, %v382_v7 }
   0x2   :  { %v319_v5 = vpack.c.bf16 %v21_v1, %v20_v0  ;;  %v23_v6 = vld [vmem:[%s493_s0 + $0x18] sm:$0xff]  ;;  %v445_v8 = vshrl.u32 %v112_v3, 7  ;;  %v450_v10 = vld [vmem:[%s495_s2] sm:$0xff] }
   0x3   :  { %v322_v9 = vpack.c.bf16 %v23_v6, %v22_v2 }
   0x4   :  { %320 = vmatpush3.bf16.msra.mxu0 %v319_v5 }
   0x5   :  { %10 = vsyncpa [#allocation4], 0  ;;  %321 = vmatprep.subr.bf16.mxu0 %v380_v4  ;;  %v147_v11 = vsub.s32 3, %v445_v8  ;;  %v119_v12 = vsub.s32 1, %v445_v8  ;;  %v161_v13 = vsub.s32 4, %v445_v8  ;;  %v133_v14 = vsub.s32 2, %v445_v8 }
   0x6   :  { %v19_v17 = vld [vmem:[%s496_s3] sm:$0x3]  ;;  %vm26_vm1 = vcmask 261120   ;;  %s383_s26 = smov 3   ;;  %s384_s27 = smov 1   ;;  %v189_v20 = vsub.s32 6, %v445_v8  ;;  %v25_v33 = vstv %s494_s1 }
   0x7   :  { %v148_v15 = vrot.slane %v450_v10, %v147_v11  ;;  %v120_v16 = vrot.slane %v450_v10, %v119_v12  ;;  %v162_v18 = vrot.slane %v450_v10, %v161_v13  ;;  %v134_v19 = vrot.slane %v450_v10, %v133_v14  ;;  %s385_s28 = smov 4   ;;  %s386_s29 = smov 2   ;;  %v111_v26 = vld [vmem:[%s495_s2 + $0x8] sm:$0x1f] }
   0x8   :  { %323 = vmatpush3.bf16.msra.mxu0 %v322_v9  ;;  %v175_v21 = vsub.s32 5, %v445_v8  ;;  %v190_v22 = vrot.slane %v450_v10, %v189_v20  ;;  %v114_v24 = vsub.s32 0, %v445_v8  ;;  %v203_v25 = vsub.s32 7, %v445_v8  ;;  %s387_s5 = smov 6   ;;  %s388_s6 = smov 5  }
   0x9   :  { %150 = vrot.lane.b32.xlu1 %v148_v15, %s383_s26  ;;  %122 = vrot.lane.b32.xlu0 %v120_v16, %s384_s27  ;;  %s389_s7 = smov 8   ;;  %s390_s8 = smov 7   ;;  %v246_v29 = vrot.slane %v111_v26, %v133_v14  ;;  %v232_v30 = vrot.slane %v111_v26, %v119_v12  ;;  %v274_v31 = vrot.slane %v111_v26, %v161_v13  ;;  %vm285_vm3 = vcmask 123904  }
   0xa   :  { %v176_v23 = vrot.slane %v450_v10, %v175_v21  ;;  %v218_v27 = vrot.slane %v111_v26, %v114_v24  ;;  %v204_v28 = vrot.slane %v450_v10, %v203_v25  ;;  %s391_s9 = smov 10   ;;  %s392_s10 = smov 9   ;;  %v260_v32 = vrot.slane %v111_v26, %v147_v11 }
   0xb   :  { %316 = vmatmul.mubr.msk.f32.vlgmr.msra.gmra.mrb[0].mxu0 %vm26_vm1, %v19_v17  ;;  %s393_s2 = smov 12   ;;  %s394_s11 = smov 11   ;;  %v115_v6 = vrot.slane %v450_v10, %v114_v24 }
   0xc   :  { %s395_s1 = smov 126   ;;  %s396_s14 = smov 127  }
   0xd   :  { %164 = vrot.lane.b32.xlu1 %v162_v18, %s385_s28  ;;  %136 = vrot.lane.b32.xlu0 %v134_v19, %s386_s29  ;;  %s397_s15 = smov 124   ;;  %s398_s16 = smov 125  }
   0xe   :  { %s399_s17 = smov 122   ;;  %s400_s18 = smov 123  }
   0xf   :  { %s401_s19 = smov 120   ;;  %s402_s20 = smov 121  }
  0x10   :  { %s403_s21 = smov 118   ;;  %s404_s22 = smov 119  }
  0x11   :  { %192 = vrot.lane.b32.xlu1 %v190_v22, %s387_s5  ;;  %178 = vrot.lane.b32.xlu0 %v176_v23, %s388_s6  ;;  %s405_s23 = smov 116   ;;  %s406_s24 = smov 117  }
  0x12   :  { %s407_s0 = smov [#allocation3]  }
  0x13   :  { %s293_s25 = sshll.u32 %s407_s0, 4  ;;  %s294_s25 = int_to_ptr.vmem [resolvable:$true] %s293_s25 }
  0x14   :  { %s356_s26 = scalar_lea.vmem %s294_s25, 32  ;;  %p361_p1 = scmp.lt.s32.totalorder %s294_s25, %s294_s25 }
  0x15   :  { %220 = vrot.lane.b32.xlu1 %v218_v27, %s389_s7  ;;  %206 = vrot.lane.b32.xlu0 %v204_v28, %s390_s8  ;;  %p357_p0 = scmp.ne.s32.totalorder %s294_s25, %s356_s26  ;;  %p362_p2 = scmp.lt.s32.totalorder %s356_s26, %s356_s26 }
  0x17   :  { %p363_p3 = por %p362_p2, %p361_p1 }
  0x19   :  { %248 = vrot.lane.b32.xlu1 %v246_v29, %s391_s9  ;;  %234 = vrot.lane.b32.xlu0 %v232_v30, %s392_s10  ;;  %p364_p4 = pnand %p363_p3, %p357_p0 }
  0x1d   :  { %276 = vrot.lane.b32.xlu1 %v274_v31, %s393_s2  ;;  %262 = vrot.lane.b32.xlu0 %v260_v32, %s394_s11 }
  0x7b   :  { %v151_v42 = vpop.permute.xlu1 %150  ;;  %v123_v43 = vpop.permute.xlu0 %122 }
  0x7f   :  { %v165_v44 = vpop.permute.xlu1 %164  ;;  %v137_v46 = vpop.permute.xlu0 %136 }
  0x83   :  { %v193_v50 = vpop.permute.xlu1 %192  ;;  %v179_v53 = vpop.permute.xlu0 %178 }
  0x87   :  { %v221_v56 = vpop.permute.xlu1 %220  ;;  %v207_v57 = vpop.permute.xlu0 %206 }
  0x8b   :  { %v249_v60 = vpop.permute.xlu1 %248  ;;  %v235_v62 = vpop.permute.xlu0 %234 }
  0x8f   :  { %v277_v2 = vpop.permute.xlu1 %276  ;;  %v263_v3 = vpop.permute.xlu0 %262 }
  0xde   :  { %v96_v34 = vpop.f32.mrb[0].mxu0 }
  0xdf   :  { %v97_v35 = vadd.f32 %v96_v34, %v25_v33  ;;  %v317_v36 = vpop.f32.mrb[1].mxu0 }
  0xe1   :  { %v100_v37 = vmul.f32 2.0, %v97_v35 }
  0xe3   :  { %v102_v38 = vmin.f32 %v100_v37, 20.0  ;;  %vm101_vm2 = vcmp.gt.f32.partialorder %v100_v37, 20.0 }
  0xe5   :  { %v103_v39 = vmul.f32 1.442695, %v102_v38 }
  0xe7   :  { %352 = vpow2.f32 %v103_v39 }
  0xf1   :  { %v353_v40 = vpop.eup %352 }
  0xf2   :  { %v105_v41 = vadd.f32 1.0, %v353_v40 }
  0xf4   :  { %354 = vlog2.f32 %v105_v41 }
  0xfe   :  { %v355_v45 = vpop.eup %354 }
  0xff   :  { %v107_v47 = vmul.f32 0.6931472, %v355_v45 }
 0x101   :  { %v108_v48 = vmul.f32 0.5, %v107_v47 }
 0x103   :  { %v109_v49 = vsel %vm101_vm2, %v97_v35, %v108_v48 }
 0x104   :  { %v125_v51 = vmul.f32 %v123_v43, %v109_v49  ;;  %v139_v52 = vmul.f32 %v137_v46, %v109_v49  ;;  %v167_v54 = vmul.f32 %v165_v44, %v109_v49  ;;  %v153_v55 = vmul.f32 %v151_v42, %v109_v49 }
 0x105   :  { %v195_v58 = vmul.f32 %v193_v50, %v109_v49  ;;  %v181_v59 = vmul.f32 %v179_v53, %v109_v49  ;;  %v223_v61 = vmul.f32 %v221_v56, %v109_v49  ;;  %v209_v63 = vmul.f32 %v207_v57, %v109_v49 }
 0x106   :  { %141 = vrot.lane.b32.xlu1 %v139_v52, %s395_s1  ;;  %127 = vrot.lane.b32.xlu0 %v125_v51, %s396_s14  ;;  %v251_v0 = vmul.f32 %v249_v60, %v109_v49  ;;  %v237_v1 = vmul.f32 %v235_v62, %v109_v49  ;;  %v279_v4 = vmul.f32 %v277_v2, %v109_v49 }
 0x107   :  { %v265_v5 = vmul.f32 %v263_v3, %v109_v49  ;;  %v116_v9 = vmul.f32 %v115_v6, %v109_v49 }
 0x10a   :  { %169 = vrot.lane.b32.xlu1 %v167_v54, %s397_s15  ;;  %155 = vrot.lane.b32.xlu0 %v153_v55, %s398_s16 }
 0x10e   :  { %197 = vrot.lane.b32.xlu1 %v195_v58, %s399_s17  ;;  %183 = vrot.lane.b32.xlu0 %v181_v59, %s400_s18 }
 0x112   :  { %225 = vrot.lane.b32.xlu1 %v223_v61, %s401_s19  ;;  %211 = vrot.lane.b32.xlu0 %v209_v63, %s402_s20 }
 0x116   :  { %253 = vrot.lane.b32.xlu1 %v251_v0, %s403_s21  ;;  %239 = vrot.lane.b32.xlu0 %v237_v1, %s404_s22 }
 0x11a   :  { %281 = vrot.lane.b32.xlu1 %v279_v4, %s405_s23  ;;  %267 = vrot.lane.b32.xlu0 %v265_v5, %s406_s24 }
 0x178   :  { %v142_v7 = vpop.permute.xlu1 %141  ;;  %v128_v11 = vpop.permute.xlu0 %127 }
 0x179   :  { %v130_v12 = vadd.f32 %v128_v11, %v116_v9 }
 0x17b   :  { %v144_v14 = vadd.f32 %v142_v7, %v130_v12 }
 0x17c   :  { %v170_v13 = vpop.permute.xlu1 %169  ;;  %v156_v15 = vpop.permute.xlu0 %155 }
 0x17d   :  { %v158_v16 = vadd.f32 %v156_v15, %v144_v14 }
 0x17f   :  { %v172_v18 = vadd.f32 %v170_v13, %v158_v16 }
 0x180   :  { %v198_v17 = vpop.permute.xlu1 %197  ;;  %v184_v19 = vpop.permute.xlu0 %183 }
 0x181   :  { %v186_v20 = vadd.f32 %v184_v19, %v172_v18 }
 0x183   :  { %v200_v22 = vadd.f32 %v198_v17, %v186_v20 }
 0x184   :  { %v226_v21 = vpop.permute.xlu1 %225  ;;  %v212_v23 = vpop.permute.xlu0 %211 }
 0x185   :  { %v214_v25 = vadd.f32 %v212_v23, %v200_v22 }
 0x187   :  { %v228_v26 = vadd.f32 %v226_v21, %v214_v25 }
 0x188   :  { %v254_v8 = vpop.permute.xlu1 %253  ;;  %v240_v27 = vpop.permute.xlu0 %239 }
 0x189   :  { %v242_v10 = vadd.f32 %v240_v27, %v228_v26 }
 0x18b   :  { %v256_v24 = vadd.f32 %v254_v8, %v242_v10 }
 0x18c   :  { %v268_v28 = vpop.permute.xlu0 %267  ;;  %v282_v30 = vpop.permute.xlu1 %281 }
 0x18d   :  { %v270_v29 = vadd.f32 %v268_v28, %v256_v24 }
 0x18f   :  { %v284_v31 = vadd.f32 %v282_v30, %v270_v29 }
 0x191   :  { %286 = vst.msk [vmem:[#allocation3] sm:$0x3] %vm285_vm3, %v284_v31 }
 0x192   :  { %367 = shalt.err (!%p364_p4)
}
 0x193   :  { %s368_s29 = scalar_lea.hbm %s497_s4, 32 }
 0x194   :  { %p369_p5 = scmp.ne.s32.totalorder %s497_s4, %s368_s29  ;;  %p372_p6 = scmp.lt.u32.totalorder %s368_s29, %s497_s4 }
 0x196   :  { %p374_p7 = pnand %p372_p6, %p369_p5 }
 0x198   :  { %377 = shalt.err (!%p374_p7)
}
 0x199   :  { %296 = dma.vmem_to_hbm [thread:$0]  %s294_s25, 32, %s497_s4, [#allocation4]  }
 0x19a   :  { %378 = dma.done.wait [#allocation4], 32  }
 0x19b   :  { %379 = vsyncadd [#allocation4], 4294967264 }
 0x19c   :  { %300 = vsyncpa [#allocation4], 1 }

// kernel: exlayers_forward.2
= control target key start
LH: loop header
LB: loop body
LE: loop exit
PB: predicated region body
PF: predicated region fallthrough
CT: control target
= control target key end

     0   :  { %v1526_v0 = vmov 0   ;;  %v1527_v27 = vmov 1   ;;  %v1528_v28 = vmov 2   ;;  %v1529_v29 = vmov 4   ;;  %s2161_s2 = inlined_call_operand.vmem [shape: f32[13,1], index: 2, kind: input, shape index: {}]   ;;  %s2162_s1 = inlined_call_operand.vmem [shape: f32[13,1], index: 1, kind: input, shape index: {}]   ;;  %s2163_s3 = inlined_call_operand.vmem [shape: f32[4,13,1], index: 3, kind: input, shape index: {}]   ;;  %s2164_s5 = inlined_call_operand.vmem [shape: f32[4,13,1], index: 5, kind: input, shape index: {}]   ;;  %s2165_s4 = inlined_call_operand.vmem [shape: f32[4,13,1], index: 4, kind: input, shape index: {}]   ;;  %s2166_s6 = inlined_call_operand.vmem [shape: f32[4,13,13], index: 6, kind: input, shape index: {}]   ;;  %s2167_s7 = inlined_call_operand.vmem [shape: f32[4,13,1], index: 7, kind: input, shape index: {}]   ;;  %s2168_s0 = inlined_call_operand.vmem [shape: f32[1,16], index: 0, kind: input, shape index: {}]   ;;  %s2169_s8 = inlined_call_operand.vmem [shape: f32[13,16], index: 8, kind: output, shape index: {}]  }
   0x1   :  { %1367 = vset.pattern.permute.xlu1 %v1526_v0  ;;  %1366 = vset.pattern.permute.xlu0 %v1526_v0  ;;  %v50_v1 = vld [vmem:[%s2161_s2] sm:$0xff]  ;;  %v51_v3 = vld [vmem:[%s2161_s2 + $0x8] sm:$0x1f]  ;;  %v1530_v30 = vmov 3   ;;  %v1531_v31 = vmov 5   ;;  %v1532_v32 = vmov 8  }
   0x2   :  { %v29_v2 = vld [vmem:[%s2162_s1] sm:$0xff]  ;;  %54 = vperm.xlu1 %1367, %v50_v1   ;;  %v30_v4 = vld [vmem:[%s2162_s1 + $0x8] sm:$0x1f]  ;;  %v1533_v33 = vmov 11   ;;  %v1654_v34 = vld [vmem:[%s2166_s6 + $0x10] sm:$0xff]  ;;  %v1534_v35 = vmov 6  }
   0x3   :  { %34 = vperm.xlu0 %1366, %v29_v2   ;;  %v65_v5 = vld [vmem:[%s2163_s3 + $0x8] sm:$0x1f]  ;;  %v64_v6 = vld [vmem:[%s2163_s3] sm:$0xff]  ;;  %v1535_v36 = vmov 7   ;;  %v1670_v37 = vld [vmem:[%s2166_s6 + $0x18] sm:$0x1f] }
   0x4   :  { %v108_v7 = vld [vmem:[%s2164_s5] sm:$0xff]  ;;  %v109_v8 = vld [vmem:[%s2164_s5 + $0x8] sm:$0x1f]  ;;  %v67_v11 = vadd.f32 1.0, %v65_v5  ;;  %v66_v12 = vadd.f32 1.0, %v64_v6  ;;  %v1536_v38 = vmov 9  }
   0x5   :  { %v110_v9 = vadd.f32 1e-05, %v108_v7  ;;  %v111_v10 = vadd.f32 1e-05, %v109_v8  ;;  %v95_v13 = vld [vmem:[%s2165_s4 + $0x8] sm:$0x1f] }
   0x6   :  { %59 = vperm.xlu1 %1367, %v51_v3   ;;  %v94_v14 = vld [vmem:[%s2165_s4] sm:$0xff]  ;;  %v1624_v26 = vld [vmem:[%s2166_s6 + $0x8] sm:$0x1f]  ;;  %v1324_v39 = vld [vmem:[%s2164_s5 + $0x18] sm:$0x1f]  ;;  %v1537_v40 = vmov 10  }
   0x7   :  { %39 = vperm.xlu0 %1366, %v30_v4   ;;  %1456 = vrsqrt.f32 %v110_v9  ;;  %vm114_vm0 = vcmp.eq.f32.partialorder %v110_v9, inf  ;;  %v117_v16 = vand.u32 2147483648, %v110_v9  ;;  %vm121_vm1 = vcmp.eq.f32.partialorder %v111_v10, inf  ;;  %v1619_v25 = vld [vmem:[%s2166_s6] sm:$0xff]  ;;  %v1323_v42 = vld [vmem:[%s2164_s5 + $0x10] sm:$0xff] }
   0x8   :  { %1458 = vrsqrt.f32 %v111_v10  ;;  %v124_v18 = vand.u32 2147483648, %v111_v10  ;;  %vm116_vm2 = vcmp.eq.f32.partialorder %v110_v9, 0.0  ;;  %vm123_vm3 = vcmp.eq.f32.partialorder %v111_v10, 0.0  ;;  %v350_v45 = vld [vmem:[%s2167_s7] sm:$0xff]  ;;  %v1318_v46 = vld [vmem:[%s2163_s3 + $0x18] sm:$0x1f] }
   0x9   :  { %v414_v41 = vadd.f32 1e-05, %v1324_v39  ;;  %v1538_v43 = vmov 12   ;;  %v413_v44 = vadd.f32 1e-05, %v1323_v42  ;;  %v1335_v47 = vld [vmem:[%s2164_s5 + $0x20] sm:$0xff] }
   0xa   :  { %75 = vperm.xlu1 %1367, %v67_v11   ;;  %v368_v49 = vadd.f32 1.0, %v1318_v46  ;;  %v718_v50 = vadd.f32 1e-05, %v1335_v47  ;;  %v1322_v52 = vld [vmem:[%s2165_s4 + $0x18] sm:$0x1f]  ;;  %v1317_v55 = vld [vmem:[%s2163_s3 + $0x10] sm:$0xff] }
   0xb   :  { %70 = vperm.xlu0 %1366, %v66_v12   ;;  %1460 = vrsqrt.f32 %v414_v41  ;;  %vm424_vm4 = vcmp.eq.f32.partialorder %v414_v41, inf  ;;  %v427_v53 = vand.u32 2147483648, %v414_v41  ;;  %v351_v54 = vld [vmem:[%s2167_s7 + $0x8] sm:$0x1f]  ;;  %vm426_vm5 = vcmp.eq.f32.partialorder %v414_v41, 0.0  ;;  %v1321_v61 = vld [vmem:[%s2165_s4 + $0x10] sm:$0xff] }
   0xc   :  { %1462 = vrsqrt.f32 %v413_v44  ;;  %v367_v58 = vadd.f32 1.0, %v1317_v55  ;;  %vm417_vm6 = vcmp.eq.f32.partialorder %v413_v44, inf  ;;  %v420_v62 = vand.u32 2147483648, %v413_v44  ;;  %v1328_v2 = vld [vmem:[%s2167_s7 + $0x18] sm:$0x1f]  ;;  %v1333_v5 = vld [vmem:[%s2165_s4 + $0x20] sm:$0xff] }
   0xd   :  { %1464 = vrsqrt.f32 %v718_v50  ;;  %vm419_vm7 = vcmp.eq.f32.partialorder %v413_v44, 0.0  ;;  %vm722_vm8 = vcmp.eq.f32.partialorder %v718_v50, inf  ;;  %v725_v6 = vand.u32 2147483648, %v718_v50  ;;  %v1314_v12 = vld [vmem:[%s2168_s0] ss:$0 sm:$0xff] }
   0xe   :  { %103 = vperm.xlu1 %1367, %v95_v13   ;;  %vm724_vm9 = vcmp.eq.f32.partialorder %v718_v50, 0.0  ;;  %v1348_v46 = vld [vmem:[%s2164_s5 + $0x38] sm:$0x1f] }
   0xf   :  { %98 = vperm.xlu0 %1366, %v94_v14  }
  0x11   :  { %v1457_v15 = vpop.eup %1456 }
  0x12   :  { %v1459_v17 = vpop.eup %1458  ;;  %v113_v19 = vmul.f32 %v1457_v15, %v110_v9 }
  0x13   :  { %v120_v20 = vmul.f32 %v1459_v17, %v111_v10 }
  0x14   :  { %v115_v21 = vsel %vm114_vm0, %v110_v9, %v113_v19  ;;  %v1733_v9 = vld [vmem:[%s2166_s6 + $0x20] sm:$0xff]  ;;  %vm1279_vm0 = vcmask 130048  }
  0x15   :  { %v122_v22 = vsel %vm121_vm1, %v111_v10, %v120_v20  ;;  %v118_v23 = vsel %vm116_vm2, %v117_v16, %v115_v21  ;;  %v1461_v48 = vpop.eup %1460  ;;  %v1753_v20 = vld [vmem:[%s2166_s6 + $0x28] sm:$0x1f]  ;;  %vm1281_vm1 = vcmask 126976  }
  0x16   :  { %v125_v24 = vsel %vm123_vm3, %v124_v18, %v122_v22  ;;  %128 = vperm.xlu0 %1366, %v118_v23   ;;  %v423_v51 = vmul.f32 %v1461_v48, %v414_v41  ;;  %v1463_v57 = vpop.eup %1462 }
  0x17   :  { %133 = vperm.xlu1 %1367, %v125_v24   ;;  %v416_v60 = vmul.f32 %v1463_v57, %v413_v44  ;;  %v1465_v63 = vpop.eup %1464 }
  0x18   :  { %v425_v56 = vsel %vm424_vm4, %v414_v41, %v423_v51  ;;  %v721_v4 = vmul.f32 %v1465_v63, %v718_v50 }
  0x19   :  { %v428_v59 = vsel %vm426_vm5, %v427_v53, %v425_v56  ;;  %v418_v1 = vsel %vm417_vm6, %v413_v44, %v416_v60 }
  0x1a   :  { %144 = vperm.xlu0 %1366, %v1619_v25   ;;  %v421_v3 = vsel %vm419_vm7, %v420_v62, %v418_v1  ;;  %v723_v7 = vsel %vm722_vm8, %v718_v50, %v721_v4  ;;  %v1024_v50 = vadd.f32 1e-05, %v1348_v46  ;;  %v152_v1 = vlaneseq }
  0x1b   :  { %149 = vperm.xlu1 %1367, %v1624_v26   ;;  %v726_v8 = vsel %vm724_vm9, %v725_v6, %v723_v7 }
  0x1c   :  { %vm1034_vm10 = vcmp.eq.f32.partialorder %v1024_v50, inf  ;;  %v1832_v7 = vshrl.u32 %v152_v1, 7  ;;  %vm1036_vm11 = vcmp.eq.f32.partialorder %v1024_v50, 0.0 }
  0x1e   :  { %1368 = vset.pattern.permute.xlu0 %v1527_v27 }
  0x1f   :  { %1369 = vset.pattern.permute.xlu1 %v1527_v27  ;;  %159 = vperm.xlu0 %1368, %v1619_v25  }
  0x20   :  { %163 = vperm.xlu1 %1369, %v1624_v26  }
  0x23   :  { %1371 = vset.pattern.permute.xlu0 %v1528_v28 }
  0x24   :  { %1370 = vset.pattern.permute.xlu1 %v1528_v28  ;;  %179 = vperm.xlu0 %1371, %v1624_v26  }
  0x25   :  { %175 = vperm.xlu1 %1370, %v1619_v25  }
  0x28   :  { %1373 = vset.pattern.permute.xlu0 %v1529_v29 }
  0x29   :  { %1372 = vset.pattern.permute.xlu1 %v1530_v30  ;;  %207 = vperm.xlu0 %1373, %v1619_v25  }
  0x2a   :  { %191 = vperm.xlu1 %1372, %v1619_v25  }
  0x2d   :  { %1376 = vset.pattern.permute.xlu0 %v1531_v31 }
  0x2e   :  { %195 = vperm.xlu1 %1372, %v1624_v26   ;;  %227 = vperm.xlu0 %1376, %v1624_v26  }
  0x32   :  { %1374 = vset.pattern.permute.xlu1 %v1529_v29  ;;  %1380 = vset.pattern.permute.xlu0 %v1532_v32 }
  0x33   :  { %211 = vperm.xlu1 %1374, %v1624_v26   ;;  %275 = vperm.xlu0 %1380, %v1624_v26  }
  0x37   :  { %1375 = vset.pattern.permute.xlu1 %v1531_v31  ;;  %1384 = vset.pattern.permute.xlu0 %v1533_v33 }
  0x38   :  { %223 = vperm.xlu1 %1375, %v1619_v25   ;;  %323 = vperm.xlu0 %1384, %v1624_v26  }
  0x3c   :  { %1377 = vset.pattern.permute.xlu1 %v1534_v35  ;;  %1389 = vset.pattern.permute.xlu0 %v1530_v30 }
  0x3d   :  { %239 = vperm.xlu1 %1377, %v1619_v25   ;;  %495 = vperm.xlu0 %1389, %v1654_v34  }
  0x41   :  { %243 = vperm.xlu1 %1377, %v1624_v26   ;;  %1393 = vset.pattern.permute.xlu0 %v1534_v35 }
  0x42   :  { %543 = vperm.xlu0 %1393, %v1654_v34  }
  0x45   :  { %1378 = vset.pattern.permute.xlu1 %v1535_v36 }
  0x46   :  { %259 = vperm.xlu1 %1378, %v1624_v26   ;;  %1394 = vset.pattern.permute.xlu0 %v1535_v36 }
  0x47   :  { %255 = vperm.xlu0 %1394, %v1619_v25  }
  0x4a   :  { %1379 = vset.pattern.permute.xlu1 %v1532_v32 }
  0x4b   :  { %271 = vperm.xlu1 %1379, %v1619_v25   ;;  %563 = vperm.xlu0 %1394, %v1670_v37  }
  0x4f   :  { %1381 = vset.pattern.permute.xlu1 %v1536_v38  ;;  %1398 = vset.pattern.permute.xlu0 %v1536_v38 }
  0x50   :  { %287 = vperm.xlu1 %1381, %v1619_v25   ;;  %591 = vperm.xlu0 %1398, %v1654_v34  }
  0x54   :  { %291 = vperm.xlu1 %1381, %v1624_v26   ;;  %1399 = vset.pattern.permute.xlu0 %v1537_v40 }
  0x55   :  { %303 = vperm.xlu0 %1399, %v1619_v25  }
  0x58   :  { %1382 = vset.pattern.permute.xlu1 %v1537_v40 }
  0x59   :  { %307 = vperm.xlu1 %1382, %v1624_v26   ;;  %611 = vperm.xlu0 %1399, %v1670_v37  }
  0x5d   :  { %1383 = vset.pattern.permute.xlu1 %v1533_v33  ;;  %1403 = vset.pattern.permute.xlu0 %v1538_v43 }
  0x5e   :  { %319 = vperm.xlu1 %1383, %v1619_v25   ;;  %639 = vperm.xlu0 %1403, %v1654_v34  }
  0x62   :  { %1385 = vset.pattern.permute.xlu1 %v1538_v43  ;;  %1404 = vset.pattern.permute.xlu0 %v1526_v0 }
  0x63   :  { %335 = vperm.xlu1 %1385, %v1619_v25   ;;  %354 = vperm.xlu0 %1404, %v350_v45  }
  0x67   :  { %339 = vperm.xlu1 %1385, %v1624_v26   ;;  %376 = vperm.xlu0 %1404, %v368_v49  }
  0x6b   :  { %1386 = vset.pattern.permute.xlu1 %v1526_v0  ;;  %405 = vperm.xlu0 %1404, %v1322_v52  }
  0x6c   :  { %359 = vperm.xlu1 %1386, %v351_v54  }
  0x6f   :  { %436 = vperm.xlu0 %1404, %v428_v59   ;;  %v1341_v59 = vld [vmem:[%s2163_s3 + $0x30] sm:$0xff] }
  0x70   :  { %371 = vperm.xlu1 %1386, %v367_v58  }
  0x73   :  { %453 = vperm.xlu0 %1404, %v1670_v37  }
  0x74   :  { %400 = vperm.xlu1 %1386, %v1321_v61  }
  0x77   :  { %664 = vperm.xlu0 %1404, %v1328_v2   ;;  %v977_v2 = vadd.f32 1.0, %v1341_v59 }
  0x78   :  { %431 = vperm.xlu1 %1386, %v421_v3   ;;  %v1342_v3 = vld [vmem:[%s2163_s3 + $0x38] sm:$0x1f] }
  0x7b   :  { %705 = vperm.xlu0 %1404, %v1333_v5  }
  0x7c   :  { %448 = vperm.xlu1 %1386, %v1654_v34  }
  0x7f   :  { %736 = vperm.xlu0 %1404, %v726_v8  }
  0x80   :  { %1387 = vset.pattern.permute.xlu1 %v1527_v27 }
  0x81   :  { %463 = vperm.xlu1 %1387, %v1654_v34   ;;  %v55_v10 = vpop.permute.xlu1 %54 }
  0x82   :  { %v35_v11 = vpop.permute.xlu0 %34 }
  0x83   :  { %753 = vperm.xlu0 %1404, %v1733_v9   ;;  %v48_v15 = vmul.f32 %v1314_v12, %v35_v11 }
  0x85   :  { %1388 = vset.pattern.permute.xlu1 %v1528_v28  ;;  %v60_v13 = vpop.permute.xlu1 %59  ;;  %v1746_v18 = vadd.f32 %v55_v10, %v48_v15  ;;  %v978_v10 = vadd.f32 1.0, %v1342_v3 }
  0x86   :  { %479 = vperm.xlu1 %1388, %v1654_v34   ;;  %v40_v14 = vpop.permute.xlu0 %39 }
  0x87   :  { %1407 = vset.pattern.permute.xlu0 %v1527_v27  ;;  %v49_v45 = vmul.f32 %v1314_v12, %v40_v14  ;;  %v1037_v12 = vand.u32 2147483648, %v1024_v50 }
  0x88   :  { %467 = vperm.xlu0 %1407, %v1670_v37  }
  0x89   :  { %v76_v16 = vpop.permute.xlu1 %75  ;;  %v1793_v51 = vadd.f32 %v60_v13, %v49_v45 }
  0x8a   :  { %483 = vperm.xlu1 %1388, %v1670_v37   ;;  %v71_v17 = vpop.permute.xlu0 %70 }
  0x8b   :  { %v78_v19 = vmul.f32 %v71_v17, %v1746_v18  ;;  %v79_v54 = vmul.f32 %v76_v16, %v1793_v51  ;;  %v1841_v16 = vsub.s32 1, %v1832_v7  ;;  %v1844_v17 = vsub.s32 0, %v1832_v7 }
  0x8c   :  { %768 = vperm.xlu0 %1407, %v1733_v9  }
  0x8d   :  { %v1758_v22 = vpop.permute.xlu1 %103  ;;  %v1315_v23 = vmul.f32 -1.442695, %v78_v19  ;;  %v1316_v57 = vmul.f32 -1.442695, %v79_v54 }
  0x8e   :  { %1390 = vset.pattern.permute.xlu1 %v1530_v30  ;;  %v1756_v21 = vpop.permute.xlu0 %98 }
  0x8f   :  { %499 = vperm.xlu1 %1390, %v1670_v37   ;;  %1466 = vpow2.f32 %v1315_v23 }
  0x90   :  { %1410 = vset.pattern.permute.xlu0 %v1528_v28 }
  0x91   :  { %788 = vperm.xlu0 %1410, %v1753_v20  }
  0x93   :  { %1391 = vset.pattern.permute.xlu1 %v1529_v29 }
  0x94   :  { %511 = vperm.xlu1 %1391, %v1654_v34  }
  0x95   :  { %1411 = vset.pattern.permute.xlu0 %v1529_v29  ;;  %v129_v24 = vpop.permute.xlu0 %128 }
  0x96   :  { %v1765_v25 = vpop.permute.xlu1 %133  ;;  %515 = vperm.xlu0 %1411, %v1670_v37  }
  0x98   :  { %1392 = vset.pattern.permute.xlu1 %v1531_v31 }
  0x99   :  { %527 = vperm.xlu1 %1392, %v1654_v34   ;;  %v1770_v26 = vpop.permute.xlu0 %144  ;;  %v1467_v44 = vpop.eup %1466 }
  0x9a   :  { %v1772_v39 = vpop.permute.xlu1 %149  ;;  %816 = vperm.xlu0 %1411, %v1733_v9   ;;  %v86_v47 = vadd.f32 1.0, %v1467_v44 }
  0x9c   :  { %1468 = vrcp.f32 %v86_v47 }
  0x9d   :  { %531 = vperm.xlu1 %1392, %v1670_v37   ;;  %1470 = vrsqrt.f32 %v1024_v50 }
  0x9e   :  { %v1776_v41 = vpop.permute.xlu0 %159  ;;  %1415 = vset.pattern.permute.xlu0 %v1534_v35  ;;  %1472 = vrcp.f32 %v129_v24  ;;  %v1336_v24 = vld [vmem:[%s2164_s5 + $0x28] sm:$0x1f] }
  0x9f   :  { %v1779_v42 = vpop.permute.xlu1 %163  ;;  %848 = vperm.xlu0 %1415, %v1733_v9   ;;  %1474 = vpow2.f32 %v1316_v57  ;;  %v1871_v54 = vadd.f32 1e-05, %v1336_v24  ;;  %v1330_v24 = vld [vmem:[%s2163_s3 + $0x28] sm:$0x1f] }
  0xa1   :  { %1395 = vset.pattern.permute.xlu1 %v1534_v35  ;;  %vm729_vm12 = vcmp.eq.f32.partialorder %v1871_v54, inf  ;;  %vm731_vm13 = vcmp.eq.f32.partialorder %v1871_v54, 0.0 }
  0xa2   :  { %547 = vperm.xlu1 %1395, %v1670_v37  }
  0xa3   :  { %v1787_v48 = vpop.permute.xlu0 %179  ;;  %1418 = vset.pattern.permute.xlu0 %v1536_v38 }
  0xa4   :  { %v1790_v49 = vpop.permute.xlu1 %175  ;;  %896 = vperm.xlu0 %1418, %v1733_v9  }
  0xa6   :  { %1396 = vset.pattern.permute.xlu1 %v1535_v36  ;;  %v1469_v58 = vpop.eup %1468 }
  0xa7   :  { %559 = vperm.xlu1 %1396, %v1654_v34   ;;  %v1471_v62 = vpop.eup %1470  ;;  %v92_v63 = vmul.f32 %v1469_v58, %v1746_v18 }
  0xa8   :  { %v1797_v52 = vpop.permute.xlu0 %207  ;;  %1421 = vset.pattern.permute.xlu0 %v1531_v31  ;;  %v1033_v4 = vmul.f32 %v1471_v62, %v1024_v50  ;;  %v1473_v11 = vpop.eup %1472 }
  0xa9   :  { %v1800_v53 = vpop.permute.xlu1 %191  ;;  %836 = vperm.xlu0 %1421, %v1753_v20   ;;  %v106_v6 = vsub.f32 %v92_v63, %v1756_v21  ;;  %v1475_v14 = vpop.eup %1474  ;;  %v1882_v63 = vsub.s32 3, %v1832_v7 }
  0xaa   :  { %v1035_v13 = vsel %vm1034_vm10, %v1024_v50, %v1033_v4  ;;  %v87_v23 = vadd.f32 1.0, %v1475_v14  ;;  %v1866_v50 = vld [vmem:[%s2166_s6 + $0x38] sm:$0x1f] }
  0xab   :  { %1397 = vset.pattern.permute.xlu1 %v1532_v32  ;;  %v1838_v15 = vmul.f32 %v1473_v11, %v106_v6  ;;  %v1038_v21 = vsel %vm1036_vm11, %v1037_v12, %v1035_v13  ;;  %v1897_v6 = vsub.s32 4, %v1832_v7 }
  0xac   :  { %575 = vperm.xlu1 %1397, %v1654_v34   ;;  %1476 = vrcp.f32 %v87_v23 }
  0xad   :  { %v1806_v55 = vpop.permute.xlu1 %195  ;;  %v1808_v56 = vpop.permute.xlu0 %227  ;;  %1424 = vset.pattern.permute.xlu0 %v1535_v36  ;;  %v169_v44 = vrot.slane %v1838_v15, %v1841_v16  ;;  %v155_v45 = vrot.slane %v1838_v15, %v1844_v17  ;;  %1478 = vrsqrt.f32 %v1871_v54  ;;  %v201_v4 = vrot.slane %v1838_v15, %v1882_v63 }
  0xae   :  { %868 = vperm.xlu0 %1424, %v1753_v20   ;;  %1480 = vrcp.f32 %v1765_v25  ;;  %v217_v23 = vrot.slane %v1838_v15, %v1897_v6 }
  0xaf   :  { %v156_v57 = vmul.f32 %v155_v45, %v1770_v26  ;;  %v170_v58 = vmul.f32 %v169_v44, %v1776_v41  ;;  %v171_v26 = vmul.f32 %v169_v44, %v1779_v42  ;;  %v157_v41 = vmul.f32 %v155_v45, %v1772_v39  ;;  %v1329_v39 = vld [vmem:[%s2163_s3 + $0x20] sm:$0xff]  ;;  %v1912_v42 = vld [vmem:[%s2166_s6 + $0x30] sm:$0xff] }
  0xb0   :  { %579 = vperm.xlu1 %1397, %v1670_v37   ;;  %v672_v14 = vadd.f32 1.0, %v1329_v39 }
  0xb1   :  { %v173_v13 = vadd.f32 %v171_v26, %v157_v41  ;;  %v673_v41 = vadd.f32 1.0, %v1330_v24 }
  0xb2   :  { %v1816_v60 = vpop.permute.xlu1 %211  ;;  %v1818_v61 = vpop.permute.xlu0 %275  ;;  %1429 = vset.pattern.permute.xlu0 %v1533_v33 }
  0xb3   :  { %932 = vperm.xlu0 %1429, %v1753_v20   ;;  %v219_v24 = vmul.f32 %v217_v23, %v1816_v60 }
  0xb4   :  { %1400 = vset.pattern.permute.xlu1 %v1536_v38 }
  0xb5   :  { %595 = vperm.xlu1 %1400, %v1670_v37  }
  0xb6   :  { %v1477_v12 = vpop.eup %1476 }
  0xb7   :  { %v1828_v5 = vpop.permute.xlu1 %223  ;;  %1430 = vset.pattern.permute.xlu0 %v1526_v0  ;;  %v1834_v8 = vpop.permute.xlu0 %323 }
  0xb8   :  { %981 = vperm.xlu0 %1430, %v977_v2   ;;  %v172_v2 = vadd.f32 %v170_v58, %v156_v57  ;;  %v1479_v57 = vpop.eup %1478  ;;  %v93_v58 = vmul.f32 %v1477_v12, %v1793_v51 }
  0xb9   :  { %1401 = vset.pattern.permute.xlu1 %v1537_v40  ;;  %v728_v39 = vmul.f32 %v1479_v57, %v1871_v54 }
  0xba   :  { %607 = vperm.xlu1 %1401, %v1654_v34  }
  0xbc   :  { %v1846_v18 = vpop.permute.xlu1 %239  ;;  %v1848_v19 = vpop.permute.xlu0 %495  ;;  %986 = vperm.xlu0 %1430, %v978_v10  }
  0xbe   :  { %1402 = vset.pattern.permute.xlu1 %v1533_v33 }
  0xbf   :  { %623 = vperm.xlu1 %1402, %v1654_v34   ;;  %v1869_v34 = vsub.s32 2, %v1832_v7 }
  0xc0   :  { %v1859_v46 = vpop.permute.xlu1 %243  ;;  %1046 = vperm.xlu0 %1430, %v1038_v21   ;;  %v202_v21 = vmul.f32 %v201_v4, %v1800_v53  ;;  %v1929_v53 = vsub.s32 5, %v1832_v7 }
  0xc1   :  { %v1861_v47 = vpop.permute.xlu0 %543  ;;  %v185_v62 = vrot.slane %v1838_v15, %v1869_v34 }
  0xc3   :  { %627 = vperm.xlu1 %1402, %v1670_v37   ;;  %v186_v3 = vmul.f32 %v185_v62, %v1790_v49  ;;  %v187_v44 = vmul.f32 %v185_v62, %v1787_v48  ;;  %v203_v48 = vmul.f32 %v201_v4, %v1806_v55  ;;  %v1938_v62 = vsub.s32 7, %v1832_v7  ;;  %v1334_v4 = vld [vmem:[%s2165_s4 + $0x28] sm:$0x1f] }
  0xc4   :  { %1063 = vperm.xlu0 %1430, %v1866_v50  }
  0xc5   :  { %v1877_v59 = vpop.permute.xlu1 %259  ;;  %v188_v49 = vadd.f32 %v186_v3, %v172_v2  ;;  %v189_v26 = vadd.f32 %v187_v44, %v173_v13  ;;  %v218_v3 = vmul.f32 %v217_v23, %v1797_v52  ;;  %v233_v52 = vrot.slane %v1838_v15, %v1929_v53 }
  0xc6   :  { %v1884_v1 = vpop.permute.xlu0 %255  ;;  %v730_v44 = vsel %vm729_vm12, %v1871_v54, %v728_v39 }
  0xc7   :  { %1405 = vset.pattern.permute.xlu1 %v1538_v43  ;;  %v204_v2 = vadd.f32 %v202_v21, %v188_v49  ;;  %v107_v49 = vsub.f32 %v93_v58, %v1758_v22  ;;  %v234_v55 = vmul.f32 %v233_v52, %v1828_v5  ;;  %v732_v22 = vand.u32 2147483648, %v1871_v54  ;;  %v1481_v21 = vpop.eup %1480 }
  0xc8   :  { %643 = vperm.xlu1 %1405, %v1670_v37   ;;  %1434 = vset.pattern.permute.xlu0 %v1527_v27  ;;  %v1327_v37 = vld [vmem:[%s2167_s7 + $0x10] sm:$0xff]  ;;  %v235_v54 = vmul.f32 %v233_v52, %v1808_v56 }
  0xc9   :  { %1077 = vperm.xlu0 %1434, %v1866_v50   ;;  %v220_v12 = vadd.f32 %v218_v3, %v204_v2  ;;  %v139_v57 = vmul.f32 %v1481_v21, %v107_v49  ;;  %v265_v2 = vrot.slane %v1838_v15, %v1938_v62  ;;  %v733_v23 = vsel %vm731_vm13, %v732_v22, %v730_v44 }
  0xca   :  { %v1899_v10 = vpop.permute.xlu1 %271  ;;  %v1904_v11 = vpop.permute.xlu0 %563 }
  0xcb   :  { %v236_v5 = vadd.f32 %v234_v55, %v220_v12  ;;  %v266_v60 = vmul.f32 %v265_v2, %v1884_v1  ;;  %v281_v39 = vrot.slane %v139_v57, %v1844_v17  ;;  %v267_v49 = vmul.f32 %v265_v2, %v1877_v59 }
  0xcc   :  { %1406 = vset.pattern.permute.xlu1 %v1526_v0  ;;  %v297_v56 = vrot.slane %v139_v57, %v1841_v16  ;;  %v329_v59 = vrot.slane %v139_v57, %v1882_v63  ;;  %v345_v2 = vrot.slane %v139_v57, %v1897_v6 }
  0xcd   :  { %659 = vperm.xlu1 %1406, %v1327_v37   ;;  %1436 = vset.pattern.permute.xlu0 %v1530_v30  ;;  %v1933_v37 = vsub.s32 6, %v1832_v7 }
  0xce   :  { %1105 = vperm.xlu0 %1436, %v1912_v42  }
  0xcf   :  { %v288_v45 = vpop.permute.xlu1 %287  ;;  %v1925_v25 = vpop.permute.xlu0 %591  ;;  %v249_v7 = vrot.slane %v1838_v15, %v1933_v37 }
  0xd0   :  { %v298_v52 = vmul.f32 %v297_v56, %v288_v45 }
  0xd1   :  { %676 = vperm.xlu1 %1406, %v672_v14   ;;  %v205_v14 = vadd.f32 %v203_v48, %v189_v26  ;;  %v250_v58 = vmul.f32 %v249_v7, %v1846_v18  ;;  %v251_v48 = vmul.f32 %v249_v7, %v1859_v46  ;;  %v313_v7 = vrot.slane %v139_v57, %v1869_v34 }
  0xd2   :  { %1439 = vset.pattern.permute.xlu0 %v1529_v29 }
  0xd3   :  { %v292_v51 = vpop.permute.xlu1 %291  ;;  %1125 = vperm.xlu0 %1439, %v1866_v50   ;;  %v221_v3 = vadd.f32 %v219_v24, %v205_v14  ;;  %v252_v18 = vadd.f32 %v250_v58, %v236_v5  ;;  %v282_v14 = vmul.f32 %v281_v39, %v1899_v10  ;;  %v283_v10 = vmul.f32 %v281_v39, %v1818_v61 }
  0xd4   :  { %v304_v13 = vpop.permute.xlu0 %303  ;;  %v299_v58 = vmul.f32 %v297_v56, %v292_v51 }
  0xd5   :  { %681 = vperm.xlu1 %1406, %v673_v41   ;;  %v237_v15 = vadd.f32 %v235_v54, %v221_v3  ;;  %v268_v1 = vadd.f32 %v266_v60, %v252_v18  ;;  %v314_v21 = vmul.f32 %v313_v7, %v304_v13 }
  0xd7   :  { %1442 = vset.pattern.permute.xlu0 %v1531_v31  ;;  %v253_v46 = vadd.f32 %v251_v48, %v237_v15  ;;  %v284_v22 = vadd.f32 %v282_v14, %v268_v1  ;;  %v331_v15 = vmul.f32 %v329_v59, %v1834_v8 }
  0xd8   :  { %v308_v26 = vpop.permute.xlu1 %307  ;;  %v1960_v41 = vpop.permute.xlu0 %611  ;;  %1141 = vperm.xlu0 %1442, %v1866_v50  }
  0xd9   :  { %710 = vperm.xlu1 %1406, %v1334_v4   ;;  %v269_v4 = vadd.f32 %v267_v49, %v253_v46  ;;  %v300_v5 = vadd.f32 %v298_v52, %v284_v22 }
  0xdb   :  { %v285_v3 = vadd.f32 %v283_v10, %v269_v4  ;;  %v316_v60 = vadd.f32 %v314_v21, %v300_v5 }
  0xdc   :  { %1444 = vset.pattern.permute.xlu0 %v1535_v36 }
  0xdd   :  { %741 = vperm.xlu1 %1406, %v733_v23   ;;  %v320_v12 = vpop.permute.xlu1 %319  ;;  %v1969_v55 = vpop.permute.xlu0 %639  ;;  %1169 = vperm.xlu0 %1444, %v1912_v42   ;;  %v315_v23 = vmul.f32 %v313_v7, %v308_v26  ;;  %v301_v61 = vadd.f32 %v299_v58, %v285_v3 }
  0xde   :  { %v330_v45 = vmul.f32 %v329_v59, %v320_v12 }
  0xdf   :  { %v317_v51 = vadd.f32 %v315_v23, %v301_v61 }
  0xe0   :  { %v332_v39 = vadd.f32 %v330_v45, %v316_v60 }
  0xe1   :  { %758 = vperm.xlu1 %1406, %v1753_v20   ;;  %1447 = vset.pattern.permute.xlu0 %v1532_v32  ;;  %v333_v1 = vadd.f32 %v331_v15, %v317_v51 }
  0xe2   :  { %v336_v24 = vpop.permute.xlu1 %335  ;;  %v355_v44 = vpop.permute.xlu0 %354  ;;  %1189 = vperm.xlu0 %1447, %v1866_v50  }
  0xe3   :  { %v346_v54 = vmul.f32 %v345_v2, %v336_v24 }
  0xe5   :  { %1408 = vset.pattern.permute.xlu1 %v1527_v27  ;;  %v348_v18 = vadd.f32 %v346_v54, %v332_v39 }
  0xe6   :  { %772 = vperm.xlu1 %1408, %v1753_v20   ;;  %v340_v13 = vpop.permute.xlu1 %339  ;;  %v377_v48 = vpop.permute.xlu0 %376  ;;  %1449 = vset.pattern.permute.xlu0 %v1537_v40 }
  0xe7   :  { %1217 = vperm.xlu0 %1449, %v1912_v42   ;;  %v347_v49 = vmul.f32 %v345_v2, %v340_v13  ;;  %v362_v12 = vadd.f32 %v355_v44, %v348_v18 }
  0xe9   :  { %v349_v46 = vadd.f32 %v347_v49, %v333_v1 }
  0xea   :  { %1409 = vset.pattern.permute.xlu1 %v1528_v28  ;;  %v1986_v57 = vpop.permute.xlu0 %405 }
  0xeb   :  { %784 = vperm.xlu1 %1409, %v1733_v9   ;;  %v360_v26 = vpop.permute.xlu1 %359  ;;  %1452 = vset.pattern.permute.xlu0 %v1533_v33 }
  0xec   :  { %1237 = vperm.xlu0 %1452, %v1866_v50   ;;  %v1995_v22 = vadd.f32 %v360_v26, %v349_v46 }
  0xee   :  { %v437_v14 = vpop.permute.xlu0 %436  ;;  %v380_v21 = vmul.f32 %v377_v48, %v1995_v22 }
  0xef   :  { %1412 = vset.pattern.permute.xlu1 %v1530_v30  ;;  %v372_v56 = vpop.permute.xlu1 %371 }
  0xf0   :  { %v379_v52 = vmul.f32 %v372_v56, %v362_v12  ;;  %800 = vperm.xlu1 %1412, %v1733_v9   ;;  %1454 = vset.pattern.permute.xlu0 %v1526_v0  ;;  %v1320_v10 = vmul.f32 -1.442695, %v380_v21 }
  0xf2   :  { %v1319_v7 = vmul.f32 -1.442695, %v379_v52  ;;  %v454_v8 = vpop.permute.xlu0 %453 }
  0xf3   :  { %v401_v4 = vpop.permute.xlu1 %400 }
  0xf4   :  { %1482 = vpow2.f32 %v1319_v7  ;;  %804 = vperm.xlu1 %1412, %v1753_v20  }
  0xf5   :  { %1484 = vpow2.f32 %v1320_v10  ;;  %v1351_v10 = vld [vmem:[%s2167_s7 + $0x30] sm:$0xff] }
  0xf6   :  { %v2001_v24 = vpop.permute.xlu0 %664  ;;  %1269 = vperm.xlu0 %1454, %v1351_v10  }
  0xf7   :  { %v432_v59 = vpop.permute.xlu1 %431 }
  0xf8   :  { %1413 = vset.pattern.permute.xlu1 %v1529_v29 }
  0xf9   :  { %820 = vperm.xlu1 %1413, %v1753_v20  }
  0xfa   :  { %v2005_v45 = vpop.permute.xlu0 %705 }
  0xfb   :  { %v449_v44 = vpop.permute.xlu1 %448 }
  0xfd   :  { %1414 = vset.pattern.permute.xlu1 %v1531_v31 }
  0xfe   :  { %v1483_v5 = vpop.eup %1482  ;;  %832 = vperm.xlu1 %1414, %v1733_v9   ;;  %v2009_v60 = vpop.permute.xlu0 %736 }
  0xff   :  { %v387_v58 = vadd.f32 1.0, %v1483_v5  ;;  %v1485_v54 = vpop.eup %1484 }
 0x100   :  { %v464_v2 = vpop.permute.xlu1 %463  ;;  %v388_v39 = vadd.f32 1.0, %v1485_v54 }
 0x101   :  { %1486 = vrcp.f32 %v387_v58 }
 0x102   :  { %1416 = vset.pattern.permute.xlu1 %v1535_v36  ;;  %1488 = vrcp.f32 %v432_v59  ;;  %v2013_v61 = vpop.permute.xlu0 %753 }
 0x103   :  { %864 = vperm.xlu1 %1416, %v1733_v9   ;;  %1490 = vrcp.f32 %v388_v39 }
 0x104   :  { %1492 = vrcp.f32 %v437_v14 }
 0x105   :  { %v480_v3 = vpop.permute.xlu1 %479 }
 0x107   :  { %1417 = vset.pattern.permute.xlu1 %v1532_v32  ;;  %v468_v56 = vpop.permute.xlu0 %467 }
 0x108   :  { %880 = vperm.xlu1 %1417, %v1733_v9  }
 0x109   :  { %v484_v23 = vpop.permute.xlu1 %483 }
 0x10b   :  { %v1487_v13 = vpop.eup %1486  ;;  %v2028_v58 = vpop.permute.xlu0 %768 }
 0x10c   :  { %v393_v48 = vmul.f32 %v1487_v13, %v362_v12  ;;  %1419 = vset.pattern.permute.xlu1 %v1537_v40  ;;  %v1489_v26 = vpop.eup %1488 }
 0x10d   :  { %912 = vperm.xlu1 %1419, %v1733_v9  }
 0x10e   :  { %v408_v51 = vsub.f32 %v393_v48, %v401_v4  ;;  %v500_v18 = vpop.permute.xlu1 %499  ;;  %v1491_v48 = vpop.eup %1490 }
 0x110   :  { %v440_v15 = vmul.f32 %v1489_v26, %v408_v51  ;;  %v394_v26 = vmul.f32 %v1491_v48, %v1995_v22 }
 0x111   :  { %1420 = vset.pattern.permute.xlu1 %v1533_v33 }
 0x112   :  { %v459_v49 = vrot.slane %v440_v15, %v1844_v17  ;;  %v473_v1 = vrot.slane %v440_v15, %v1841_v16  ;;  %v489_v12 = vrot.slane %v440_v15, %v1869_v34  ;;  %928 = vperm.xlu1 %1420, %v1733_v9   ;;  %v505_v4 = vrot.slane %v440_v15, %v1882_v63 }
 0x113   :  { %v512_v46 = vpop.permute.xlu1 %511  ;;  %v409_v10 = vsub.f32 %v394_v26, %v1986_v57  ;;  %v569_v48 = vrot.slane %v440_v15, %v1938_v62 }
 0x114   :  { %v460_v52 = vmul.f32 %v459_v49, %v449_v44  ;;  %v474_v7 = vmul.f32 %v473_v1, %v464_v2  ;;  %v490_v21 = vmul.f32 %v489_v12, %v480_v3  ;;  %v461_v44 = vmul.f32 %v459_v49, %v454_v8  ;;  %v1339_v8 = vld [vmem:[%s2167_s7 + $0x20] sm:$0xff] }
 0x115   :  { %v475_v2 = vmul.f32 %v473_v1, %v468_v56  ;;  %v506_v13 = vmul.f32 %v505_v4, %v1848_v19  ;;  %v521_v3 = vrot.slane %v440_v15, %v1897_v6  ;;  %v491_v19 = vmul.f32 %v489_v12, %v484_v23  ;;  %v1347_v56 = vld [vmem:[%s2164_s5 + $0x30] sm:$0xff] }
 0x116   :  { %v476_v59 = vadd.f32 %v474_v7, %v460_v52  ;;  %1422 = vset.pattern.permute.xlu1 %v1538_v43  ;;  %v2035_v52 = vpop.permute.xlu0 %788  ;;  %v537_v1 = vrot.slane %v440_v15, %v1929_v53  ;;  %v1023_v12 = vadd.f32 1e-05, %v1347_v56 }
 0x117   :  { %944 = vperm.xlu1 %1422, %v1733_v9   ;;  %v477_v51 = vadd.f32 %v475_v2, %v461_v44  ;;  %v522_v14 = vmul.f32 %v521_v3, %v512_v46 }
 0x118   :  { %v492_v5 = vadd.f32 %v490_v21, %v476_v59  ;;  %v528_v54 = vpop.permute.xlu1 %527  ;;  %v553_v59 = vrot.slane %v440_v15, %v1933_v37  ;;  %v1493_v21 = vpop.eup %1492  ;;  %1494 = vrsqrt.f32 %v1023_v12  ;;  %vm1027_vm14 = vcmp.eq.f32.partialorder %v1023_v12, inf }
 0x119   :  { %v493_v7 = vadd.f32 %v491_v19, %v477_v51  ;;  %v538_v46 = vmul.f32 %v537_v1, %v528_v54  ;;  %vm1029_vm15 = vcmp.eq.f32.partialorder %v1023_v12, 0.0 }
 0x11a   :  { %v508_v39 = vadd.f32 %v506_v13, %v492_v5  ;;  %v507_v5 = vmul.f32 %v505_v4, %v500_v18  ;;  %v516_v44 = vpop.permute.xlu0 %515  ;;  %v554_v13 = vmul.f32 %v553_v59, %v1861_v47 }
 0x11b   :  { %1423 = vset.pattern.permute.xlu1 %v1534_v35  ;;  %v523_v51 = vmul.f32 %v521_v3, %v516_v44 }
 0x11c   :  { %852 = vperm.xlu1 %1423, %v1753_v20   ;;  %v532_v9 = vpop.permute.xlu1 %531  ;;  %v524_v49 = vadd.f32 %v522_v14, %v508_v39  ;;  %v509_v2 = vadd.f32 %v507_v5, %v493_v7  ;;  %v442_v39 = vmul.f32 %v1493_v21, %v409_v10 }
 0x11d   :  { %v539_v18 = vmul.f32 %v537_v1, %v532_v9  ;;  %v571_v9 = vmul.f32 %v569_v48, %v1904_v11  ;;  %v1340_v11 = vld [vmem:[%s2167_s7 + $0x28] sm:$0x1f] }
 0x11e   :  { %v540_v23 = vadd.f32 %v538_v46, %v524_v49  ;;  %v525_v57 = vadd.f32 %v523_v51, %v509_v2  ;;  %v585_v26 = vrot.slane %v442_v39, %v1844_v17  ;;  %v601_v10 = vrot.slane %v442_v39, %v1841_v16 }
 0x120   :  { %1425 = vset.pattern.permute.xlu1 %v1526_v0  ;;  %v556_v14 = vadd.f32 %v554_v13, %v540_v23  ;;  %v541_v49 = vadd.f32 %v539_v18, %v525_v57 }
 0x121   :  { %964 = vperm.xlu1 %1425, %v1339_v8   ;;  %v548_v22 = vpop.permute.xlu1 %547 }
 0x122   :  { %v555_v47 = vmul.f32 %v553_v59, %v548_v22  ;;  %v1495_v46 = vpop.eup %1494  ;;  %v617_v22 = vrot.slane %v442_v39, %v1869_v34 }
 0x123   :  { %v1026_v5 = vmul.f32 %v1495_v46, %v1023_v12 }
 0x124   :  { %v557_v7 = vadd.f32 %v555_v47, %v541_v49  ;;  %v619_v13 = vmul.f32 %v617_v22, %v1960_v41  ;;  %v649_v41 = vrot.slane %v442_v39, %v1897_v6 }
 0x125   :  { %1426 = vset.pattern.permute.xlu1 %v1532_v32 }
 0x126   :  { %884 = vperm.xlu1 %1426, %v1753_v20   ;;  %v560_v54 = vpop.permute.xlu1 %559  ;;  %v573_v21 = vadd.f32 %v571_v9, %v557_v7  ;;  %v650_v49 = vmul.f32 %v649_v41, %v1969_v55 }
 0x127   :  { %v570_v8 = vmul.f32 %v569_v48, %v560_v54  ;;  %v1030_v48 = vand.u32 2147483648, %v1023_v12  ;;  %v1028_v54 = vsel %vm1027_vm14, %v1023_v12, %v1026_v5  ;;  %v1345_v12 = vld [vmem:[%s2165_s4 + $0x30] sm:$0xff] }
 0x129   :  { %v572_v4 = vadd.f32 %v570_v8, %v556_v14  ;;  %v602_v8 = vmul.f32 %v601_v10, %v1925_v25 }
 0x12a   :  { %1427 = vset.pattern.permute.xlu1 %v1536_v38 }
 0x12b   :  { %900 = vperm.xlu1 %1427, %v1753_v20   ;;  %v576_v19 = vpop.permute.xlu1 %575 }
 0x12c   :  { %v586_v15 = vmul.f32 %v585_v26, %v576_v19 }
 0x12e   :  { %v588_v56 = vadd.f32 %v586_v15, %v572_v4  ;;  %v633_v4 = vrot.slane %v442_v39, %v1882_v63 }
 0x12f   :  { %1428 = vset.pattern.permute.xlu1 %v1537_v40  ;;  %v580_v3 = vpop.permute.xlu1 %579 }
 0x130   :  { %916 = vperm.xlu1 %1428, %v1753_v20   ;;  %v587_v1 = vmul.f32 %v585_v26, %v580_v3  ;;  %v604_v18 = vadd.f32 %v602_v8, %v588_v56 }
 0x132   :  { %v589_v23 = vadd.f32 %v587_v1, %v573_v21 }
 0x134   :  { %1431 = vset.pattern.permute.xlu1 %v1538_v43  ;;  %v596_v59 = vpop.permute.xlu1 %595 }
 0x135   :  { %v603_v44 = vmul.f32 %v601_v10, %v596_v59  ;;  %948 = vperm.xlu1 %1431, %v1753_v20   ;;  %v1031_v20 = vsel %vm1029_vm15, %v1030_v48, %v1028_v54 }
 0x137   :  { %v605_v2 = vadd.f32 %v603_v44, %v589_v23 }
 0x139   :  { %1432 = vset.pattern.permute.xlu1 %v1526_v0  ;;  %v608_v51 = vpop.permute.xlu1 %607  ;;  %v621_v14 = vadd.f32 %v619_v13, %v605_v2 }
 0x13a   :  { %969 = vperm.xlu1 %1432, %v1340_v11   ;;  %v618_v57 = vmul.f32 %v617_v22, %v608_v51  ;;  %v1346_v11 = vld [vmem:[%s2165_s4 + $0x38] sm:$0x1f]  ;;  %v817_v51 = vpop.permute.xlu0 %816 }
 0x13c   :  { %v620_v47 = vadd.f32 %v618_v57, %v604_v18 }
 0x13e   :  { %1041 = vperm.xlu1 %1432, %v1031_v20   ;;  %v624_v26 = vpop.permute.xlu1 %623 }
 0x13f   :  { %v634_v19 = vmul.f32 %v633_v4, %v624_v26  ;;  %v849_v26 = vpop.permute.xlu0 %848 }
 0x141   :  { %v636_v15 = vadd.f32 %v634_v19, %v620_v47 }
 0x142   :  { %1010 = vperm.xlu1 %1432, %v1345_v12   ;;  %v628_v25 = vpop.permute.xlu1 %627 }
 0x143   :  { %v635_v7 = vmul.f32 %v633_v4, %v628_v25  ;;  %v652_v3 = vadd.f32 %v650_v49, %v636_v15 }
 0x145   :  { %v637_v56 = vadd.f32 %v635_v7, %v621_v14 }
 0x146   :  { %1058 = vperm.xlu1 %1432, %v1912_v42  }
 0x147   :  { %v644_v46 = vpop.permute.xlu1 %643 }
 0x148   :  { %v651_v39 = vmul.f32 %v649_v41, %v644_v46 }
 0x14a   :  { %1433 = vset.pattern.permute.xlu1 %v1527_v27  ;;  %v653_v1 = vadd.f32 %v651_v39, %v637_v56 }
 0x14b   :  { %1073 = vperm.xlu1 %1433, %v1912_v42  }
 0x14c   :  { %v660_v9 = vpop.permute.xlu1 %659  ;;  %v668_v59 = vadd.f32 %v2001_v24, %v653_v1 }
 0x14d   :  { %v667_v21 = vadd.f32 %v660_v9, %v652_v3  ;;  %v897_v9 = vpop.permute.xlu0 %896 }
 0x14f   :  { %1435 = vset.pattern.permute.xlu1 %v1528_v28 }
 0x150   :  { %1089 = vperm.xlu1 %1435, %v1912_v42   ;;  %v677_v55 = vpop.permute.xlu1 %676 }
 0x151   :  { %v684_v10 = vmul.f32 %v677_v55, %v667_v21 }
 0x153   :  { %v1331_v22 = vmul.f32 -1.442695, %v684_v10 }
 0x154   :  { %1093 = vperm.xlu1 %1435, %v1866_v50   ;;  %v682_v5 = vpop.permute.xlu1 %681 }
 0x155   :  { %1496 = vpow2.f32 %v1331_v22  ;;  %v685_v27 = vmul.f32 %v682_v5, %v668_v59 }
 0x157   :  { %v1332_v23 = vmul.f32 -1.442695, %v685_v27 }
 0x158   :  { %1437 = vset.pattern.permute.xlu1 %v1530_v30  ;;  %v711_v44 = vpop.permute.xlu1 %710 }
 0x159   :  { %1498 = vpow2.f32 %v1332_v23  ;;  %1109 = vperm.xlu1 %1437, %v1866_v50  }
 0x15c   :  { %v742_v28 = vpop.permute.xlu1 %741 }
 0x15d   :  { %1438 = vset.pattern.permute.xlu1 %v1529_v29 }
 0x15e   :  { %1121 = vperm.xlu1 %1438, %v1912_v42  }
 0x15f   :  { %v1497_v2 = vpop.eup %1496 }
 0x160   :  { %v692_v13 = vadd.f32 1.0, %v1497_v2  ;;  %v759_v24 = vpop.permute.xlu1 %758 }
 0x162   :  { %1500 = vrcp.f32 %v692_v13  ;;  %1440 = vset.pattern.permute.xlu1 %v1526_v0 }
 0x163   :  { %v1499_v30 = vpop.eup %1498  ;;  %1015 = vperm.xlu1 %1440, %v1346_v11   ;;  %1502 = vrcp.f32 %v2009_v60 }
 0x164   :  { %v693_v48 = vadd.f32 1.0, %v1499_v30 }
 0x165   :  { %v773_v54 = vpop.permute.xlu1 %772 }
 0x166   :  { %1504 = vrcp.f32 %v693_v48 }
 0x167   :  { %1441 = vset.pattern.permute.xlu1 %v1531_v31  ;;  %1506 = vrcp.f32 %v742_v28  ;;  %v837_v28 = vpop.permute.xlu0 %836 }
 0x168   :  { %1137 = vperm.xlu1 %1441, %v1912_v42  }
 0x16a   :  { %v785_v29 = vpop.permute.xlu1 %784 }
 0x16c   :  { %v1501_v14 = vpop.eup %1500  ;;  %1443 = vset.pattern.permute.xlu1 %v1534_v35 }
 0x16d   :  { %v698_v8 = vmul.f32 %v1501_v14, %v667_v21  ;;  %1153 = vperm.xlu1 %1443, %v1912_v42   ;;  %v1503_v57 = vpop.eup %1502 }
 0x16f   :  { %v713_v20 = vsub.f32 %v698_v8, %v2005_v45  ;;  %v801_v18 = vpop.permute.xlu1 %800 }
 0x170   :  { %v1505_v60 = vpop.eup %1504 }
 0x171   :  { %v745_v4 = vmul.f32 %v1503_v57, %v713_v20  ;;  %v699_v41 = vmul.f32 %v1505_v60, %v668_v59  ;;  %1157 = vperm.xlu1 %1443, %v1866_v50   ;;  %v1507_v35 = vpop.eup %1506 }
 0x173   :  { %v714_v31 = vsub.f32 %v699_v41, %v711_v44  ;;  %v764_v47 = vrot.slane %v745_v4, %v1844_v17  ;;  %v778_v19 = vrot.slane %v745_v4, %v1841_v16  ;;  %v805_v12 = vpop.permute.xlu1 %804  ;;  %v794_v15 = vrot.slane %v745_v4, %v1869_v34 }
 0x174   :  { %v810_v49 = vrot.slane %v745_v4, %v1882_v63  ;;  %v826_v46 = vrot.slane %v745_v4, %v1897_v6 }
 0x175   :  { %v2099_v25 = vmul.f32 %v1507_v35, %v714_v31  ;;  %v765_v45 = vmul.f32 %v764_v47, %v2013_v61  ;;  %v766_v7 = vmul.f32 %v764_v47, %v759_v24  ;;  %1445 = vset.pattern.permute.xlu1 %v1535_v36  ;;  %v779_v3 = vmul.f32 %v778_v19, %v2028_v58 }
 0x176   :  { %v780_v56 = vmul.f32 %v778_v19, %v773_v54  ;;  %1173 = vperm.xlu1 %1445, %v1866_v50   ;;  %v796_v39 = vmul.f32 %v794_v15, %v2035_v52  ;;  %v795_v55 = vmul.f32 %v794_v15, %v785_v29  ;;  %v812_v10 = vmul.f32 %v810_v49, %v805_v12 }
 0x177   :  { %v781_v21 = vadd.f32 %v779_v3, %v765_v45  ;;  %v811_v5 = vmul.f32 %v810_v49, %v801_v18  ;;  %v842_v36 = vrot.slane %v745_v4, %v1929_v53  ;;  %v827_v58 = vmul.f32 %v826_v46, %v817_v51 }
 0x178   :  { %v782_v1 = vadd.f32 %v780_v56, %v766_v7  ;;  %v821_v22 = vpop.permute.xlu1 %820  ;;  %v858_v52 = vrot.slane %v745_v4, %v1933_v37  ;;  %v874_v29 = vrot.slane %v745_v4, %v1938_v62  ;;  %v906_v57 = vrot.slane %v2099_v25, %v1841_v16 }
 0x179   :  { %v828_v59 = vmul.f32 %v826_v46, %v821_v22  ;;  %v797_v61 = vadd.f32 %v795_v55, %v781_v21  ;;  %v844_v13 = vmul.f32 %v842_v36, %v837_v28  ;;  %v890_v20 = vrot.slane %v2099_v25, %v1844_v17  ;;  %v869_v46 = vpop.permute.xlu0 %868 }
 0x17a   :  { %v798_v27 = vadd.f32 %v796_v39, %v782_v1  ;;  %1446 = vset.pattern.permute.xlu1 %v1532_v32  ;;  %v859_v32 = vmul.f32 %v858_v52, %v849_v26  ;;  %v907_v41 = vmul.f32 %v906_v57, %v897_v9  ;;  %v922_v26 = vrot.slane %v2099_v25, %v1869_v34 }
 0x17b   :  { %1185 = vperm.xlu1 %1446, %v1912_v42   ;;  %v813_v23 = vadd.f32 %v811_v5, %v797_v61  ;;  %v938_v35 = vrot.slane %v2099_v25, %v1882_v63  ;;  %v954_v45 = vrot.slane %v2099_v25, %v1897_v6 }
 0x17c   :  { %v814_v44 = vadd.f32 %v812_v10, %v798_v27 }
 0x17d   :  { %v833_v2 = vpop.permute.xlu1 %832  ;;  %v829_v11 = vadd.f32 %v827_v58, %v813_v23  ;;  %v933_v22 = vpop.permute.xlu0 %932 }
 0x17e   :  { %v830_v24 = vadd.f32 %v828_v59, %v814_v44  ;;  %v843_v30 = vmul.f32 %v842_v36, %v833_v2 }
 0x17f   :  { %1448 = vset.pattern.permute.xlu1 %v1536_v38 }
 0x180   :  { %v845_v48 = vadd.f32 %v843_v30, %v829_v11  ;;  %1201 = vperm.xlu1 %1448, %v1912_v42   ;;  %v846_v54 = vadd.f32 %v844_v13, %v830_v24 }
 0x181   :  { %v982_v5 = vpop.permute.xlu0 %981 }
 0x182   :  { %v865_v51 = vpop.permute.xlu1 %864  ;;  %v861_v14 = vadd.f32 %v859_v32, %v845_v48 }
 0x183   :  { %v875_v8 = vmul.f32 %v874_v29, %v865_v51 }
 0x184   :  { %1205 = vperm.xlu1 %1448, %v1866_v50  }
 0x185   :  { %v877_v38 = vadd.f32 %v875_v8, %v861_v14 }
 0x187   :  { %v881_v18 = vpop.permute.xlu1 %880 }
 0x188   :  { %v891_v60 = vmul.f32 %v890_v20, %v881_v18  ;;  %1450 = vset.pattern.permute.xlu1 %v1537_v40 }
 0x189   :  { %1221 = vperm.xlu1 %1450, %v1866_v50  }
 0x18a   :  { %v893_v4 = vadd.f32 %v891_v60, %v877_v38 }
 0x18c   :  { %v913_v31 = vpop.permute.xlu1 %912  ;;  %v909_v47 = vadd.f32 %v907_v41, %v893_v4 }
 0x18d   :  { %v923_v19 = vmul.f32 %v922_v26, %v913_v31  ;;  %1451 = vset.pattern.permute.xlu1 %v1533_v33  ;;  %v1352_v33 = vld [vmem:[%s2167_s7 + $0x38] sm:$0x1f] }
 0x18e   :  { %1233 = vperm.xlu1 %1451, %v1912_v42  }
 0x18f   :  { %v925_v12 = vadd.f32 %v923_v19, %v909_v47 }
 0x191   :  { %v929_v15 = vpop.permute.xlu1 %928 }
 0x192   :  { %v939_v40 = vmul.f32 %v938_v35, %v929_v15  ;;  %1453 = vset.pattern.permute.xlu1 %v1538_v43 }
 0x193   :  { %1249 = vperm.xlu1 %1453, %v1912_v42   ;;  %v876_v42 = vmul.f32 %v874_v29, %v869_v46  ;;  %v987_v29 = vpop.permute.xlu0 %986 }
 0x194   :  { %v941_v49 = vadd.f32 %v939_v40, %v925_v12 }
 0x196   :  { %v945_v7 = vpop.permute.xlu1 %944 }
 0x197   :  { %v955_v3 = vmul.f32 %v954_v45, %v945_v7  ;;  %1253 = vperm.xlu1 %1453, %v1866_v50   ;;  %v1047_v18 = vpop.permute.xlu0 %1046 }
 0x199   :  { %v957_v56 = vadd.f32 %v955_v3, %v941_v49 }
 0x19b   :  { %1455 = vset.pattern.permute.xlu1 %v1526_v0  ;;  %v853_v39 = vpop.permute.xlu1 %852  ;;  %v940_v0 = vmul.f32 %v938_v35, %v933_v22  ;;  %v1064_v4 = vpop.permute.xlu0 %1063 }
 0x19c   :  { %v860_v43 = vmul.f32 %v858_v52, %v853_v39  ;;  %1274 = vperm.xlu1 %1455, %v1352_v33  }
 0x19e   :  { %v862_v9 = vadd.f32 %v860_v43, %v846_v54 }
 0x19f   :  { %v1078_v15 = vpop.permute.xlu0 %1077 }
 0x1a0   :  { %v965_v1 = vpop.permute.xlu1 %964  ;;  %v878_v21 = vadd.f32 %v876_v42, %v862_v9 }
 0x1a1   :  { %v972_v61 = vadd.f32 %v965_v1, %v957_v56 }
 0x1a3   :  { %v989_v58 = vmul.f32 %v982_v5, %v972_v61  ;;  %v1106_v3 = vpop.permute.xlu0 %1105 }
 0x1a5   :  { %v885_v25 = vpop.permute.xlu1 %884  ;;  %v1343_v52 = vmul.f32 -1.442695, %v989_v58 }
 0x1a6   :  { %v892_v55 = vmul.f32 %v890_v20, %v885_v25 }
 0x1a7   :  { %1508 = vpow2.f32 %v1343_v52  ;;  %v1126_v25 = vpop.permute.xlu0 %1125 }
 0x1a8   :  { %v894_v10 = vadd.f32 %v892_v55, %v878_v21 }
 0x1aa   :  { %v901_v50 = vpop.permute.xlu1 %900 }
 0x1ab   :  { %v908_v59 = vmul.f32 %v906_v57, %v901_v50 }
 0x1ad   :  { %v910_v36 = vadd.f32 %v908_v59, %v894_v10 }
 0x1af   :  { %v917_v27 = vpop.permute.xlu1 %916 }
 0x1b0   :  { %v924_v23 = vmul.f32 %v922_v26, %v917_v27 }
 0x1b1   :  { %v1509_v32 = vpop.eup %1508 }
 0x1b2   :  { %v926_v44 = vadd.f32 %v924_v23, %v910_v36  ;;  %v997_v14 = vadd.f32 1.0, %v1509_v32 }
 0x1b4   :  { %v949_v28 = vpop.permute.xlu1 %948  ;;  %v942_v2 = vadd.f32 %v940_v0, %v926_v44  ;;  %1510 = vrcp.f32 %v997_v14  ;;  %v1142_v44 = vpop.permute.xlu0 %1141 }
 0x1b5   :  { %v956_v13 = vmul.f32 %v954_v45, %v949_v28 }
 0x1b7   :  { %v958_v24 = vadd.f32 %v956_v13, %v942_v2 }
 0x1b9   :  { %v970_v11 = vpop.permute.xlu1 %969 }
 0x1ba   :  { %v973_v48 = vadd.f32 %v970_v11, %v958_v24 }
 0x1bc   :  { %v990_v51 = vmul.f32 %v987_v29, %v973_v48 }
 0x1bd   :  { %v1042_v30 = vpop.permute.xlu1 %1041 }
 0x1be   :  { %v1344_v57 = vmul.f32 -1.442695, %v990_v51  ;;  %v1511_v60 = vpop.eup %1510 }
 0x1bf   :  { %v1003_v31 = vmul.f32 %v1511_v60, %v972_v61 }
 0x1c0   :  { %1512 = vpow2.f32 %v1344_v57 }
 0x1c1   :  { %v1011_v54 = vpop.permute.xlu1 %1010  ;;  %1514 = vrcp.f32 %v1042_v30 }
 0x1c2   :  { %v1018_v35 = vsub.f32 %v1003_v31, %v1011_v54 }
 0x1c5   :  { %v1059_v8 = vpop.permute.xlu1 %1058 }
 0x1ca   :  { %v1074_v20 = vpop.permute.xlu1 %1073  ;;  %v1513_v26 = vpop.eup %1512 }
 0x1cb   :  { %v1515_v19 = vpop.eup %1514  ;;  %v998_v12 = vadd.f32 1.0, %v1513_v26 }
 0x1cc   :  { %v1050_v40 = vmul.f32 %v1515_v19, %v1018_v35 }
 0x1cd   :  { %1516 = vrcp.f32 %v998_v12 }
 0x1ce   :  { %v1069_v45 = vrot.slane %v1050_v40, %v1844_v17  ;;  %v1083_v7 = vrot.slane %v1050_v40, %v1841_v16  ;;  %1518 = vrcp.f32 %v1047_v18  ;;  %v1099_v39 = vrot.slane %v1050_v40, %v1869_v34 }
 0x1cf   :  { %v1090_v38 = vpop.permute.xlu1 %1089  ;;  %v1115_v1 = vrot.slane %v1050_v40, %v1882_v63  ;;  %v1131_v61 = vrot.slane %v1050_v40, %v1897_v6  ;;  %v1147_v2 = vrot.slane %v1050_v40, %v1929_v53  ;;  %v1163_v54 = vrot.slane %v1050_v40, %v1933_v37 }
 0x1d0   :  { %v1071_v56 = vmul.f32 %v1069_v45, %v1064_v4  ;;  %v1085_v46 = vmul.f32 %v1083_v7, %v1078_v15  ;;  %v1070_v43 = vmul.f32 %v1069_v45, %v1059_v8  ;;  %v1084_v42 = vmul.f32 %v1083_v7, %v1074_v20  ;;  %v1170_v8 = vpop.permute.xlu0 %1169 }
 0x1d1   :  { %v1100_v59 = vmul.f32 %v1099_v39, %v1090_v38  ;;  %v1133_v28 = vmul.f32 %v1131_v61, %v1126_v25  ;;  %v1116_v13 = vmul.f32 %v1115_v1, %v1106_v3  ;;  %v1149_v14 = vmul.f32 %v1147_v2, %v1142_v44 }
 0x1d2   :  { %v1087_v10 = vadd.f32 %v1085_v46, %v1071_v56  ;;  %v1086_v50 = vadd.f32 %v1084_v42, %v1070_v43  ;;  %v1179_v18 = vrot.slane %v1050_v40, %v1938_v62 }
 0x1d3   :  { %v1094_v41 = vpop.permute.xlu1 %1093 }
 0x1d4   :  { %v1101_v9 = vmul.f32 %v1099_v39, %v1094_v41  ;;  %v1102_v52 = vadd.f32 %v1100_v59, %v1086_v50  ;;  %v1190_v31 = vpop.permute.xlu0 %1189  ;;  %v1180_v12 = vmul.f32 %v1179_v18, %v1170_v8 }
 0x1d6   :  { %v1103_v5 = vadd.f32 %v1101_v9, %v1087_v10  ;;  %v1118_v29 = vadd.f32 %v1116_v13, %v1102_v52 }
 0x1d7   :  { %v1517_v21 = vpop.eup %1516 }
 0x1d8   :  { %v1110_v47 = vpop.permute.xlu1 %1109  ;;  %v1004_v36 = vmul.f32 %v1517_v21, %v973_v48  ;;  %v1519_v0 = vpop.eup %1518 }
 0x1d9   :  { %v1117_v22 = vmul.f32 %v1115_v1, %v1110_v47 }
 0x1db   :  { %v1119_v27 = vadd.f32 %v1117_v22, %v1103_v5 }
 0x1dd   :  { %v1122_v49 = vpop.permute.xlu1 %1121  ;;  %v1135_v11 = vadd.f32 %v1133_v28, %v1119_v27 }
 0x1de   :  { %v1132_v24 = vmul.f32 %v1131_v61, %v1122_v49 }
 0x1df   :  { %v1151_v38 = vadd.f32 %v1149_v14, %v1135_v11 }
 0x1e0   :  { %v1134_v57 = vadd.f32 %v1132_v24, %v1118_v29 }
 0x1e2   :  { %v1016_v33 = vpop.permute.xlu1 %1015 }
 0x1e3   :  { %v1019_v58 = vsub.f32 %v1004_v36, %v1016_v33  ;;  %v1218_v33 = vpop.permute.xlu0 %1217 }
 0x1e5   :  { %v1052_v30 = vmul.f32 %v1519_v0, %v1019_v58 }
 0x1e7   :  { %v1138_v55 = vpop.permute.xlu1 %1137  ;;  %v1195_v60 = vrot.slane %v1052_v30, %v1844_v17  ;;  %v1227_v3 = vrot.slane %v1052_v30, %v1869_v34  ;;  %v1211_v62 = vrot.slane %v1052_v30, %v1841_v16  ;;  %v1243_v1 = vrot.slane %v1052_v30, %v1882_v63  ;;  %v1238_v21 = vpop.permute.xlu0 %1237 }
 0x1e8   :  { %v1148_v51 = vmul.f32 %v1147_v2, %v1138_v55  ;;  %v1259_v61 = vrot.slane %v1052_v30, %v1897_v6 }
 0x1e9   :  { %v1197_v19 = vmul.f32 %v1195_v60, %v1190_v31  ;;  %v1228_v56 = vmul.f32 %v1227_v3, %v1218_v33  ;;  %v1245_v10 = vmul.f32 %v1243_v1, %v1238_v21 }
 0x1ea   :  { %v1150_v53 = vadd.f32 %v1148_v51, %v1134_v57 }
 0x1eb   :  { %v1270_v0 = vpop.permute.xlu0 %1269 }
 0x1ec   :  { %v1154_v23 = vpop.permute.xlu1 %1153 }
 0x1ed   :  { %v1164_v20 = vmul.f32 %v1163_v54, %v1154_v23 }
 0x1ef   :  { %v1166_v47 = vadd.f32 %v1164_v20, %v1150_v53 }
 0x1f0   :  { %v1158_v32 = vpop.permute.xlu1 %1157 }
 0x1f1   :  { %v1165_v48 = vmul.f32 %v1163_v54, %v1158_v32  ;;  %v1182_v49 = vadd.f32 %v1180_v12, %v1166_v47 }
 0x1f3   :  { %v1167_v4 = vadd.f32 %v1165_v48, %v1151_v38 }
 0x1f5   :  { %v1174_v41 = vpop.permute.xlu1 %1173 }
 0x1f6   :  { %v1181_v26 = vmul.f32 %v1179_v18, %v1174_v41 }
 0x1f8   :  { %v1183_v37 = vadd.f32 %v1181_v26, %v1167_v4 }
 0x1fa   :  { %v1186_v35 = vpop.permute.xlu1 %1185  ;;  %v1199_v15 = vadd.f32 %v1197_v19, %v1183_v37 }
 0x1fb   :  { %v1196_v45 = vmul.f32 %v1195_v60, %v1186_v35 }
 0x1fd   :  { %v1198_v7 = vadd.f32 %v1196_v45, %v1182_v49 }
 0x1ff   :  { %v1202_v40 = vpop.permute.xlu1 %1201 }
 0x200   :  { %v1212_v17 = vmul.f32 %v1211_v62, %v1202_v40 }
 0x202   :  { %v1214_v46 = vadd.f32 %v1212_v17, %v1198_v7 }
 0x203   :  { %v1206_v39 = vpop.permute.xlu1 %1205 }
 0x204   :  { %v1213_v43 = vmul.f32 %v1211_v62, %v1206_v39  ;;  %v1230_v42 = vadd.f32 %v1228_v56, %v1214_v46 }
 0x206   :  { %v1215_v9 = vadd.f32 %v1213_v43, %v1199_v15 }
 0x208   :  { %v1222_v25 = vpop.permute.xlu1 %1221 }
 0x209   :  { %v1229_v55 = vmul.f32 %v1227_v3, %v1222_v25 }
 0x20b   :  { %v1231_v22 = vadd.f32 %v1229_v55, %v1215_v9 }
 0x20d   :  { %v1234_v50 = vpop.permute.xlu1 %1233  ;;  %v1247_v34 = vadd.f32 %v1245_v10, %v1231_v22 }
 0x20e   :  { %v1244_v59 = vmul.f32 %v1243_v1, %v1234_v50 }
 0x210   :  { %v1246_v16 = vadd.f32 %v1244_v59, %v1230_v42 }
 0x212   :  { %v1250_v5 = vpop.permute.xlu1 %1249 }
 0x213   :  { %v1260_v36 = vmul.f32 %v1259_v61, %v1250_v5 }
 0x215   :  { %v1262_v27 = vadd.f32 %v1260_v36, %v1246_v16 }
 0x216   :  { %v1254_v58 = vpop.permute.xlu1 %1253 }
 0x217   :  { %v1261_v23 = vmul.f32 %v1259_v61, %v1254_v58  ;;  %v1277_v52 = vadd.f32 %v1270_v0, %v1262_v27 }
 0x219   :  { %v1263_v44 = vadd.f32 %v1261_v23, %v1247_v34  ;;  %v1280_v2 = vsel %vm1279_vm0, %v1277_v52, -inf }
 0x21b   :  { %v1275_v63 = vpop.permute.xlu1 %1274 }
 0x21c   :  { %v1278_v28 = vadd.f32 %v1275_v63, %v1263_v44 }
 0x21e   :  { %v1282_v13 = vsel %vm1281_vm1, %v1278_v28, -inf }
 0x21f   :  { %v1283_v24 = vmax.f32 %v1280_v2, %v1282_v13 }
 0x221   :  { %v1284_v11 = vrot.slane %v1283_v24, 4 }
 0x223   :  { %v1285_v54 = vmax.f32 %v1283_v24, %v1284_v11 }
 0x225   :  { %v1286_v6 = vrot.slane %v1285_v54, 2 }
 0x227   :  { %v1287_v30 = vmax.f32 %v1285_v54, %v1286_v6 }
 0x229   :  { %v1288_v32 = vrot.slane %v1287_v30, 1 }
 0x22b   :  { %v1289_v29 = vmax.f32 %v1287_v30, %v1288_v32 }
 0x22d   :  { %v1290_v51 = vsub.f32 %v1277_v52, %v1289_v29  ;;  %v1291_v14 = vsub.f32 %v1278_v28, %v1289_v29 }
 0x22f   :  { %v1292_v48 = vmul.f32 1.442695, %v1290_v51  ;;  %v1294_v8 = vmul.f32 1.442695, %v1291_v14 }
 0x231   :  { %1520 = vpow2.f32 %v1292_v48 }
 0x232   :  { %1522 = vpow2.f32 %v1294_v8 }
 0x23b   :  { %v1521_v57 = vpop.eup %1520 }
 0x23c   :  { %v1523_v20 = vpop.eup %1522  ;;  %v1296_v18 = vsel %vm1279_vm0, %v1521_v57, 0.0 }
 0x23d   :  { %v1297_v38 = vsel %vm1281_vm1, %v1523_v20, 0.0 }
 0x23e   :  { %v1298_v60 = vadd.f32 %v1297_v38, %v1296_v18 }
 0x240   :  { %v1299_v53 = vrot.slane %v1298_v60, 4 }
 0x242   :  { %v1300_v41 = vadd.f32 %v1299_v53, %v1298_v60 }
 0x244   :  { %v1301_v4 = vrot.slane %v1300_v41, 2 }
 0x246   :  { %v1302_v26 = vadd.f32 %v1301_v4, %v1300_v41 }
 0x248   :  { %v1303_v31 = vrot.slane %v1302_v26, 1 }
 0x24a   :  { %v1304_v47 = vadd.f32 %v1303_v31, %v1302_v26 }
 0x24c   :  { %1524 = vrcp.f32 %v1304_v47 }
 0x256   :  { %v1525_v37 = vpop.eup %1524 }
 0x257   :  { %v1306_v19 = vmul.f32 %v1525_v37, %v1521_v57  ;;  %v1307_v12 = vmul.f32 %v1525_v37, %v1523_v20 }
 0x259   :  { %1308 = vst.msk [vmem:[%s2169_s8] sm:$0xff] %vm1279_vm0, %v1306_v19 }
 0x25a   :  { %1309 = vst.msk [vmem:[%s2169_s8 + $0x8] sm:$0x1f] %vm1281_vm1, %v1307_v12 }

</bundles_post_ra>
